<compile_context>
chip_gen: v5e
topology: v5e:2x2
jax: 0.10.0
libtpu: 0.0.40
codegen_flags: <defaults>
</compile_context>

<pallas_src>
import functools

import jax
import jax.numpy as jnp
from jax.experimental import pallas as pl
from jax.experimental.pallas import tpu as pltpu


FP = 128  # padded (lane-dense) feature width


# --------------------------------------------------------------------------- kernel

def _sage_layer_kernel(a_ref, invdeg_ref, h_ref, ws_ref, wn_ref, b_ref, o_ref,
                       *, apply_relu):
    """One SAGEConv('mean') layer for a tile of tm destination rows."""
    tm = o_ref.shape[0]

    # Expand the int8 binary adjacency row-tile to bf16 on the VPU (hidden under DMA).
    a_tile = a_ref[...].astype(jnp.float32).astype(jnp.bfloat16)        # [tm, N]
    h_all = h_ref[...]                                                  # [N, FP] bf16

    # Neighbor SUM on the MXU (bf16 in, f32 acc); exact f32 1/deg row scale afterwards.
    ah = jnp.dot(a_tile, h_all, preferred_element_type=jnp.float32)     # [tm, FP] f32
    ah = ah * invdeg_ref[...]                                           # [tm, 1] broadcast

    # Self rows: dynamic slice of the resident H (pure VMEM view, no extra DMA).
    row0 = pl.multiple_of(pl.program_id(0) * tm, tm)
    h_self = h_ref[pl.ds(row0, tm), :]                                  # [tm, FP] bf16

    # Two K=128 matmuls instead of a K=256 lane-concat (no [tm, 2*FP] temporary).
    out = jnp.dot(h_self, ws_ref[...], preferred_element_type=jnp.float32)
    out = out + jnp.dot(ah.astype(jnp.bfloat16), wn_ref[...],
                        preferred_element_type=jnp.float32)
    out = out + b_ref[...]                                              # f32 bias
    if apply_relu:
        out = jnp.maximum(out, 0.0)                                     # ReLU in f32 (VPU)
    o_ref[...] = out.astype(o_ref.dtype)                                # lane-dense store


def _sage_layer(a_i8, inv_deg, h, ws, wn, b, *, apply_relu, out_dtype, tm):
    n = a_i8.shape[0]
    assert n % tm == 0, "demo path assumes N % tm == 0"
    out_bytes = jnp.dtype(out_dtype).itemsize

    # VMEM budget: streamed A tiles + 1/deg tiles (double-buffered), resident H,
    # weights, bias, output tiles.  2x headroom, capped at v7x physical VMEM.
    vmem_bytes = (
        2 * tm * n * 1              # A int8 row tiles (double-buffered)
        + 2 * tm * 128 * 4          # 1/deg tiles (lane-padded)
        + 2 * n * FP * 2            # resident H (x2 headroom)
        + 2 * 2 * FP * FP * 2       # W_self / W_neigh (bf16)
        + 2 * 8 * FP * 4            # bias (sublane-padded)
        + 2 * tm * FP * out_bytes   # output tiles (double-buffered)
    )
    vmem_limit = int(min(2 * vmem_bytes + (4 << 20), 64 << 20))

    flops = 2 * n * n * FP + 2 * n * (2 * FP) * FP
    bytes_accessed = (n * n                # A int8
                      + n * 4              # 1/deg
                      + n * FP * 2         # H
                      + 2 * FP * FP * 2    # weights
                      + FP * 4             # bias
                      + n * FP * out_bytes)

    kernel = functools.partial(_sage_layer_kernel, apply_relu=apply_relu)

    return pl.pallas_call(
        kernel,
        out_shape=jax.ShapeDtypeStruct((n, FP), out_dtype),
        grid=(n // tm,),
        in_specs=[
            pl.BlockSpec((tm, n), lambda i: (i, 0)),     # A row tile (streamed)
            pl.BlockSpec((tm, 1), lambda i: (i, 0)),     # 1/deg row tile
            pl.BlockSpec((n, FP), lambda i: (0, 0)),     # H (resident in VMEM)
            pl.BlockSpec((FP, FP), lambda i: (0, 0)),    # W_self (resident)
            pl.BlockSpec((FP, FP), lambda i: (0, 0)),    # W_neigh (resident)
            pl.BlockSpec((1, FP), lambda i: (0, 0)),     # bias (resident)
        ],
        out_specs=pl.BlockSpec((tm, FP), lambda i: (i, 0)),
        compiler_params=pltpu.CompilerParams(
            dimension_semantics=("parallel",),
            vmem_limit_bytes=vmem_limit),
        cost_estimate=pl.CostEstimate(flops=int(flops), transcendentals=0,
                                      bytes_accessed=int(bytes_accessed)),
    )(a_i8, inv_deg, h, ws, wn, b)


# --------------------------------------------------------------------------- wrapper

def _pad2(m, rows, cols):
    return jnp.pad(m, ((0, rows - m.shape[0]), (0, cols - m.shape[1])))


def prepare_inputs(a_bin, x, params):
    """One-time preprocessing, hoisted out of the per-call hot path:
    int8 binary adjacency, f32 1/deg, bf16 lane-padded features and weight slabs."""
    n = a_bin.shape[0]
    a_i8 = a_bin.astype(jnp.int8)
    deg = a_bin.astype(jnp.float32).sum(axis=1, keepdims=True)
    inv_deg = 1.0 / jnp.maximum(deg, 1.0)                               # f32 [N, 1]
    x_p = _pad2(x, n, FP).astype(jnp.bfloat16)                          # [N, FP] bf16
    packed = tuple(
        (_pad2(ws, FP, FP).astype(jnp.bfloat16),
         _pad2(wn, FP, FP).astype(jnp.bfloat16),
         jnp.pad(b, (0, FP - b.shape[0])).reshape(1, FP).astype(jnp.float32))
        for (ws, wn, b) in params)
    return a_i8, inv_deg, x_p, packed


@functools.partial(jax.jit, static_argnames=("n_classes", "tm"))
def sage_forward(a_i8, inv_deg, x_p, layer_params, *, n_classes, tm=128):
    """3-layer SAGE forward (eval mode): three dst-row-tiled Pallas layer calls."""
    n_layers = len(layer_params)
    h = x_p
    for l, (ws, wn, b) in enumerate(layer_params):
        last = (l == n_layers - 1)
        h = _sage_layer(a_i8, inv_deg, h, ws, wn, b,
                        apply_relu=not last,
                        out_dtype=jnp.float32 if last else jnp.bfloat16,
                        tm=tm)
    return h[:, :n_classes]


# --------------------------------------------------------------------------- references

def sage_reference_f32(a_mean, x, params):
    """Plain-JAX f32 reference (original module semantics, eval mode)."""
    h = x
    for l, (w_self, w_neigh, b) in enumerate(params):
        h = h @ w_self + (a_mean @ h) @ w_neigh + b
        if l != len(params) - 1:
            h = jnp.maximum(h, 0.0)
    return h


def sage_reference_quant(a_bin, inv_deg, x, params):
    """Reference mirroring the kernel's arithmetic: bf16 MXU inputs, f32 accumulation,
    exact binary-A sum + f32 1/deg scale, bf16 intermediate storage."""
    bf = jnp.bfloat16
    a = a_bin.astype(jnp.float32).astype(bf)
    h = x.astype(bf)
    out = None
    for l, (ws, wn, b) in enumerate(params):
        ah = inv_deg * jnp.dot(a, h, preferred_element_type=jnp.float32)
        out = (jnp.dot(h, ws.astype(bf), preferred_element_type=jnp.float32)
               + jnp.dot(ah.astype(bf), wn.astype(bf), preferred_element_type=jnp.float32)
               + b)
        if l != len(params) - 1:
            h = jnp.maximum(out, 0.0).astype(bf)
    return out


# --------------------------------------------------------------------------- demo

def build_graph(n_nodes, n_neighbors=4):
    """Deterministic ring-like graph; returns the binary (0/1) adjacency, int8."""
    idx = jnp.arange(n_nodes)
    a = jnp.zeros((n_nodes, n_nodes), dtype=jnp.int8)
    for k in range(1, n_neighbors + 1):
        a = a.at[idx, (idx + k) % n_nodes].set(1)
    return a


if __name__ == "__main__":
    # small shapes consistent with SAGE(in_feats, n_hidden, n_classes)
    N = 256            # number of graph nodes (2 row tiles -> exercises the parallel grid)
    TM = 128           # dst-row tile
    in_feats = 32
    n_hidden = 32
    n_classes = 8

    key = jax.random.PRNGKey(0)
    k_x, k_p = jax.random.split(key)
    x = jax.random.normal(k_x, (N, in_feats), dtype=jnp.float32)
    a_bin = build_graph(N)

    # deterministic parameter init (3 SAGEConv layers: W_self, W_neigh, bias)
    dims = [(in_feats, n_hidden), (n_hidden, n_hidden), (n_hidden, n_classes)]
    params = []
    keys = jax.random.split(k_p, len(dims) * 2)
    for l, (fi, fo) in enumerate(dims):
        scale = 1.0 / jnp.sqrt(jnp.float32(fi))
        w_self = jax.random.normal(keys[2 * l], (fi, fo), jnp.float32) * scale
        w_neigh = jax.random.normal(keys[2 * l + 1], (fi, fo), jnp.float32) * scale
        bias = jnp.zeros((fo,), jnp.float32)
        params.append((w_self, w_neigh, bias))

    # one-time preprocessing (hoisted out of the jitted hot path)
    a_i8, inv_deg, x_p, packed = prepare_inputs(a_bin, x, params)

    out = sage_forward(a_i8, inv_deg, x_p, packed, n_classes=n_classes, tm=TM)
    out = jax.block_until_ready(out)
    assert out.shape == (N, n_classes)

    # tight check vs. a reference applying the same quantization scheme
    ref_q = sage_reference_quant(a_bin, inv_deg, x, params)
    assert jnp.allclose(out, ref_q, atol=5e-3, rtol=5e-3), \
        float(jnp.max(jnp.abs(out - ref_q)))

    # sanity check vs. the pure-f32 reference (bf16 H/W -> ~1% relative error)
    a_mean = a_bin.astype(jnp.float32) * inv_deg
    ref_f32 = sage_reference_f32(a_mean, x, params)
    rel = jnp.linalg.norm(out - ref_f32) / jnp.linalg.norm(ref_f32)
    assert float(rel) < 5e-2, float(rel)

    print("KERNEL_OK")
</pallas_src>

<mosaic_0001>
module attributes {stable_mosaic.version = 11 : i64} {
  func.func @_sage_layer_kernel(%arg0: i32, %arg1: memref<128x256xi8, #tpu.memory_space<vmem>>, %arg2: memref<128x1xf32, #tpu.memory_space<vmem>>, %arg3: memref<256x128xbf16, #tpu.memory_space<vmem>>, %arg4: memref<128x128xbf16, #tpu.memory_space<vmem>>, %arg5: memref<128x128xbf16, #tpu.memory_space<vmem>>, %arg6: memref<1x128xf32, #tpu.memory_space<vmem>>, %arg7: memref<128x128xbf16, #tpu.memory_space<vmem>>) attributes {dimension_semantics = [#tpu.dimension_semantics<parallel>], iteration_bounds = array<i64: 2>, scalar_prefetch = 0 : i64, scratch_operands = 0 : i64, tpu.core_type = #tpu.core_type<tc>, window_params = [{transform_indices = @transform_0, window_bounds = array<i64: 128, 256>}, {transform_indices = @transform_1, window_bounds = array<i64: 128, 1>}, {pipeline_mode = #tpu.pipeline_mode<synchronous>, transform_indices = @transform_2, window_bounds = array<i64: 256, 128>}, {pipeline_mode = #tpu.pipeline_mode<synchronous>, transform_indices = @transform_3, window_bounds = array<i64: 128, 128>}, {pipeline_mode = #tpu.pipeline_mode<synchronous>, transform_indices = @transform_4, window_bounds = array<i64: 128, 128>}, {pipeline_mode = #tpu.pipeline_mode<synchronous>, transform_indices = @transform_5, window_bounds = array<i64: 1, 128>}, {transform_indices = @transform_6, window_bounds = array<i64: 128, 128>}]} {
    %c0 = arith.constant 0 : index
    %c0_0 = arith.constant 0 : index
    %0 = vector.load %arg1[%c0, %c0_0] : memref<128x256xi8, #tpu.memory_space<vmem>>, vector<128x256xi8>
    %1 = arith.sitofp %0 : vector<128x256xi8> to vector<128x256xf32>
    %2 = arith.truncf %1 : vector<128x256xf32> to vector<128x256xbf16>
    %c0_1 = arith.constant 0 : index
    %c0_2 = arith.constant 0 : index
    %3 = vector.load %arg3[%c0_1, %c0_2] : memref<256x128xbf16, #tpu.memory_space<vmem>>, vector<256x128xbf16>
    %cst = arith.constant dense<0.000000e+00> : vector<128x128xf32>
    %4 = tpu.matmul %2, %3, %cst {dimension_numbers = #tpu.dot_dimension_numbers<[1], [0], [0], [1], [0, 0, 1, 1], [], []>} : vector<128x256xbf16>, vector<256x128xbf16>, vector<128x128xf32> -> vector<128x128xf32>
    %c0_3 = arith.constant 0 : index
    %c0_4 = arith.constant 0 : index
    %5 = vector.load %arg2[%c0_3, %c0_4] : memref<128x1xf32, #tpu.memory_space<vmem>>, vector<128x1xf32>
    %6 = vector.broadcast %5 : vector<128x1xf32> to vector<128x128xf32>
    %7 = arith.mulf %4, %6 : vector<128x128xf32>
    %c128_i32 = arith.constant 128 : i32
    %8 = arith.muli %arg0, %c128_i32 : i32
    %9 = tpu.assume_multiple %8, 128 : i32
    %10 = arith.index_cast %9 : i32 to index
    %c0_5 = arith.constant 0 : index
    %11 = vector.load %arg3[%10, %c0_5] : memref<256x128xbf16, #tpu.memory_space<vmem>>, vector<128x128xbf16>
    %c0_6 = arith.constant 0 : index
    %c0_7 = arith.constant 0 : index
    %12 = vector.load %arg4[%c0_6, %c0_7] : memref<128x128xbf16, #tpu.memory_space<vmem>>, vector<128x128xbf16>
    %cst_8 = arith.constant dense<0.000000e+00> : vector<128x128xf32>
    %13 = tpu.matmul %11, %12, %cst_8 {dimension_numbers = #tpu.dot_dimension_numbers<[1], [0], [0], [1], [0, 0, 1, 1], [], []>} : vector<128x128xbf16>, vector<128x128xbf16>, vector<128x128xf32> -> vector<128x128xf32>
    %14 = arith.truncf %7 : vector<128x128xf32> to vector<128x128xbf16>
    %c0_9 = arith.constant 0 : index
    %c0_10 = arith.constant 0 : index
    %15 = vector.load %arg5[%c0_9, %c0_10] : memref<128x128xbf16, #tpu.memory_space<vmem>>, vector<128x128xbf16>
    %cst_11 = arith.constant dense<0.000000e+00> : vector<128x128xf32>
    %16 = tpu.matmul %14, %15, %cst_11 {dimension_numbers = #tpu.dot_dimension_numbers<[1], [0], [0], [1], [0, 0, 1, 1], [], []>} : vector<128x128xbf16>, vector<128x128xbf16>, vector<128x128xf32> -> vector<128x128xf32>
    %17 = arith.addf %13, %16 : vector<128x128xf32>
    %c0_12 = arith.constant 0 : index
    %c0_13 = arith.constant 0 : index
    %18 = vector.load %arg6[%c0_12, %c0_13] : memref<1x128xf32, #tpu.memory_space<vmem>>, vector<1x128xf32>
    %19 = vector.broadcast %18 : vector<1x128xf32> to vector<128x128xf32>
    %20 = arith.addf %17, %19 : vector<128x128xf32>
    %cst_14 = arith.constant 0.000000e+00 : f32
    %21 = vector.broadcast %cst_14 : f32 to vector<128x128xf32>
    %22 = arith.maximumf %20, %21 : vector<128x128xf32>
    %23 = arith.truncf %22 : vector<128x128xf32> to vector<128x128xbf16>
    %c0_15 = arith.constant 0 : index
    %c0_16 = arith.constant 0 : index
    %24 = vector.load %arg7[%c0_15, %c0_16] : memref<128x128xbf16, #tpu.memory_space<vmem>>, vector<128x128xbf16>
    tpu.vector_store %arg7[%c0_15, %c0_16], %23 {strides = array<i32>} : memref<128x128xbf16, #tpu.memory_space<vmem>>, vector<128x128xbf16>,
    return
  }
  func.func @transform_0(%arg0: i32) -> (i32, i32) {
    %c0_i32 = arith.constant 0 : i32
    %c0_i32_0 = arith.constant 0 : i32
    return %arg0, %c0_i32 : i32, i32
  }
  func.func @transform_1(%arg0: i32) -> (i32, i32) {
    %c0_i32 = arith.constant 0 : i32
    %c0_i32_0 = arith.constant 0 : i32
    return %arg0, %c0_i32 : i32, i32
  }
  func.func @transform_2(%arg0: i32) -> (i32, i32) {
    %c0_i32 = arith.constant 0 : i32
    %c0_i32_0 = arith.constant 0 : i32
    %c0_i32_1 = arith.constant 0 : i32
    return %c0_i32, %c0_i32_0 : i32, i32
  }
  func.func @transform_3(%arg0: i32) -> (i32, i32) {
    %c0_i32 = arith.constant 0 : i32
    %c0_i32_0 = arith.constant 0 : i32
    %c0_i32_1 = arith.constant 0 : i32
    return %c0_i32, %c0_i32_0 : i32, i32
  }
  func.func @transform_4(%arg0: i32) -> (i32, i32) {
    %c0_i32 = arith.constant 0 : i32
    %c0_i32_0 = arith.constant 0 : i32
    %c0_i32_1 = arith.constant 0 : i32
    return %c0_i32, %c0_i32_0 : i32, i32
  }
  func.func @transform_5(%arg0: i32) -> (i32, i32) {
    %c0_i32 = arith.constant 0 : i32
    %c0_i32_0 = arith.constant 0 : i32
    %c0_i32_1 = arith.constant 0 : i32
    return %c0_i32, %c0_i32_0 : i32, i32
  }
  func.func @transform_6(%arg0: i32) -> (i32, i32) {
    %c0_i32 = arith.constant 0 : i32
    %c0_i32_0 = arith.constant 0 : i32
    return %arg0, %c0_i32 : i32, i32
  }
}

module attributes {stable_mosaic.version = 11 : i64} {
  func.func @_sage_layer_kernel(%arg0: i32, %arg1: memref<128x256xi8, #tpu.memory_space<vmem>>, %arg2: memref<128x1xf32, #tpu.memory_space<vmem>>, %arg3: memref<256x128xbf16, #tpu.memory_space<vmem>>, %arg4: memref<128x128xbf16, #tpu.memory_space<vmem>>, %arg5: memref<128x128xbf16, #tpu.memory_space<vmem>>, %arg6: memref<1x128xf32, #tpu.memory_space<vmem>>, %arg7: memref<128x128xf32, #tpu.memory_space<vmem>>) attributes {dimension_semantics = [#tpu.dimension_semantics<parallel>], iteration_bounds = array<i64: 2>, scalar_prefetch = 0 : i64, scratch_operands = 0 : i64, tpu.core_type = #tpu.core_type<tc>, window_params = [{transform_indices = @transform_0, window_bounds = array<i64: 128, 256>}, {transform_indices = @transform_1, window_bounds = array<i64: 128, 1>}, {pipeline_mode = #tpu.pipeline_mode<synchronous>, transform_indices = @transform_2, window_bounds = array<i64: 256, 128>}, {pipeline_mode = #tpu.pipeline_mode<synchronous>, transform_indices = @transform_3, window_bounds = array<i64: 128, 128>}, {pipeline_mode = #tpu.pipeline_mode<synchronous>, transform_indices = @transform_4, window_bounds = array<i64: 128, 128>}, {pipeline_mode = #tpu.pipeline_mode<synchronous>, transform_indices = @transform_5, window_bounds = array<i64: 1, 128>}, {transform_indices = @transform_6, window_bounds = array<i64: 128, 128>}]} {
    %c0 = arith.constant 0 : index
    %c0_0 = arith.constant 0 : index
    %0 = vector.load %arg1[%c0, %c0_0] : memref<128x256xi8, #tpu.memory_space<vmem>>, vector<128x256xi8>
    %1 = arith.sitofp %0 : vector<128x256xi8> to vector<128x256xf32>
    %2 = arith.truncf %1 : vector<128x256xf32> to vector<128x256xbf16>
    %c0_1 = arith.constant 0 : index
    %c0_2 = arith.constant 0 : index
    %3 = vector.load %arg3[%c0_1, %c0_2] : memref<256x128xbf16, #tpu.memory_space<vmem>>, vector<256x128xbf16>
    %cst = arith.constant dense<0.000000e+00> : vector<128x128xf32>
    %4 = tpu.matmul %2, %3, %cst {dimension_numbers = #tpu.dot_dimension_numbers<[1], [0], [0], [1], [0, 0, 1, 1], [], []>} : vector<128x256xbf16>, vector<256x128xbf16>, vector<128x128xf32> -> vector<128x128xf32>
    %c0_3 = arith.constant 0 : index
    %c0_4 = arith.constant 0 : index
    %5 = vector.load %arg2[%c0_3, %c0_4] : memref<128x1xf32, #tpu.memory_space<vmem>>, vector<128x1xf32>
    %6 = vector.broadcast %5 : vector<128x1xf32> to vector<128x128xf32>
    %7 = arith.mulf %4, %6 : vector<128x128xf32>
    %c128_i32 = arith.constant 128 : i32
    %8 = arith.muli %arg0, %c128_i32 : i32
    %9 = tpu.assume_multiple %8, 128 : i32
    %10 = arith.index_cast %9 : i32 to index
    %c0_5 = arith.constant 0 : index
    %11 = vector.load %arg3[%10, %c0_5] : memref<256x128xbf16, #tpu.memory_space<vmem>>, vector<128x128xbf16>
    %c0_6 = arith.constant 0 : index
    %c0_7 = arith.constant 0 : index
    %12 = vector.load %arg4[%c0_6, %c0_7] : memref<128x128xbf16, #tpu.memory_space<vmem>>, vector<128x128xbf16>
    %cst_8 = arith.constant dense<0.000000e+00> : vector<128x128xf32>
    %13 = tpu.matmul %11, %12, %cst_8 {dimension_numbers = #tpu.dot_dimension_numbers<[1], [0], [0], [1], [0, 0, 1, 1], [], []>} : vector<128x128xbf16>, vector<128x128xbf16>, vector<128x128xf32> -> vector<128x128xf32>
    %14 = arith.truncf %7 : vector<128x128xf32> to vector<128x128xbf16>
    %c0_9 = arith.constant 0 : index
    %c0_10 = arith.constant 0 : index
    %15 = vector.load %arg5[%c0_9, %c0_10] : memref<128x128xbf16, #tpu.memory_space<vmem>>, vector<128x128xbf16>
    %cst_11 = arith.constant dense<0.000000e+00> : vector<128x128xf32>
    %16 = tpu.matmul %14, %15, %cst_11 {dimension_numbers = #tpu.dot_dimension_numbers<[1], [0], [0], [1], [0, 0, 1, 1], [], []>} : vector<128x128xbf16>, vector<128x128xbf16>, vector<128x128xf32> -> vector<128x128xf32>
    %17 = arith.addf %13, %16 : vector<128x128xf32>
    %c0_12 = arith.constant 0 : index
    %c0_13 = arith.constant 0 : index
    %18 = vector.load %arg6[%c0_12, %c0_13] : memref<1x128xf32, #tpu.memory_space<vmem>>, vector<1x128xf32>
    %19 = vector.broadcast %18 : vector<1x128xf32> to vector<128x128xf32>
    %20 = arith.addf %17, %19 : vector<128x128xf32>
    %c0_14 = arith.constant 0 : index
    %c0_15 = arith.constant 0 : index
    %21 = vector.load %arg7[%c0_14, %c0_15] : memref<128x128xf32, #tpu.memory_space<vmem>>, vector<128x128xf32>
    tpu.vector_store %arg7[%c0_14, %c0_15], %20 {strides = array<i32>} : memref<128x128xf32, #tpu.memory_space<vmem>>, vector<128x128xf32>,
    return
  }
  func.func @transform_0(%arg0: i32) -> (i32, i32) {
    %c0_i32 = arith.constant 0 : i32
    %c0_i32_0 = arith.constant 0 : i32
    return %arg0, %c0_i32 : i32, i32
  }
  func.func @transform_1(%arg0: i32) -> (i32, i32) {
    %c0_i32 = arith.constant 0 : i32
    %c0_i32_0 = arith.constant 0 : i32
    return %arg0, %c0_i32 : i32, i32
  }
  func.func @transform_2(%arg0: i32) -> (i32, i32) {
    %c0_i32 = arith.constant 0 : i32
    %c0_i32_0 = arith.constant 0 : i32
    %c0_i32_1 = arith.constant 0 : i32
    return %c0_i32, %c0_i32_0 : i32, i32
  }
  func.func @transform_3(%arg0: i32) -> (i32, i32) {
    %c0_i32 = arith.constant 0 : i32
    %c0_i32_0 = arith.constant 0 : i32
    %c0_i32_1 = arith.constant 0 : i32
    return %c0_i32, %c0_i32_0 : i32, i32
  }
  func.func @transform_4(%arg0: i32) -> (i32, i32) {
    %c0_i32 = arith.constant 0 : i32
    %c0_i32_0 = arith.constant 0 : i32
    %c0_i32_1 = arith.constant 0 : i32
    return %c0_i32, %c0_i32_0 : i32, i32
  }
  func.func @transform_5(%arg0: i32) -> (i32, i32) {
    %c0_i32 = arith.constant 0 : i32
    %c0_i32_0 = arith.constant 0 : i32
    %c0_i32_1 = arith.constant 0 : i32
    return %c0_i32, %c0_i32_0 : i32, i32
  }
  func.func @transform_6(%arg0: i32) -> (i32, i32) {
    %c0_i32 = arith.constant 0 : i32
    %c0_i32_0 = arith.constant 0 : i32
    return %arg0, %c0_i32 : i32, i32
  }
}

module attributes {stable_mosaic.version = 11 : i64} {
  func.func @_sage_layer_kernel(%arg0: i32, %arg1: memref<128x256xi8, #tpu.memory_space<vmem>>, %arg2: memref<128x1xf32, #tpu.memory_space<vmem>>, %arg3: memref<256x128xbf16, #tpu.memory_space<vmem>>, %arg4: memref<128x128xbf16, #tpu.memory_space<vmem>>, %arg5: memref<128x128xbf16, #tpu.memory_space<vmem>>, %arg6: memref<1x128xf32, #tpu.memory_space<vmem>>, %arg7: memref<128x128xbf16, #tpu.memory_space<vmem>>) attributes {dimension_semantics = [#tpu.dimension_semantics<parallel>], iteration_bounds = array<i64: 2>, scalar_prefetch = 0 : i64, scratch_operands = 0 : i64, tpu.core_type = #tpu.core_type<tc>, window_params = [{transform_indices = @transform_0, window_bounds = array<i64: 128, 256>}, {transform_indices = @transform_1, window_bounds = array<i64: 128, 1>}, {pipeline_mode = #tpu.pipeline_mode<synchronous>, transform_indices = @transform_2, window_bounds = array<i64: 256, 128>}, {pipeline_mode = #tpu.pipeline_mode<synchronous>, transform_indices = @transform_3, window_bounds = array<i64: 128, 128>}, {pipeline_mode = #tpu.pipeline_mode<synchronous>, transform_indices = @transform_4, window_bounds = array<i64: 128, 128>}, {pipeline_mode = #tpu.pipeline_mode<synchronous>, transform_indices = @transform_5, window_bounds = array<i64: 1, 128>}, {transform_indices = @transform_6, window_bounds = array<i64: 128, 128>}]} {
    %c0 = arith.constant 0 : index
    %c0_0 = arith.constant 0 : index
    %0 = vector.load %arg1[%c0, %c0_0] : memref<128x256xi8, #tpu.memory_space<vmem>>, vector<128x256xi8>
    %1 = arith.sitofp %0 : vector<128x256xi8> to vector<128x256xf32>
    %2 = arith.truncf %1 : vector<128x256xf32> to vector<128x256xbf16>
    %c0_1 = arith.constant 0 : index
    %c0_2 = arith.constant 0 : index
    %3 = vector.load %arg3[%c0_1, %c0_2] : memref<256x128xbf16, #tpu.memory_space<vmem>>, vector<256x128xbf16>
    %cst = arith.constant dense<0.000000e+00> : vector<128x128xf32>
    %4 = tpu.matmul %2, %3, %cst {dimension_numbers = #tpu.dot_dimension_numbers<[1], [0], [0], [1], [0, 0, 1, 1], [], []>} : vector<128x256xbf16>, vector<256x128xbf16>, vector<128x128xf32> -> vector<128x128xf32>
    %c0_3 = arith.constant 0 : index
    %c0_4 = arith.constant 0 : index
    %5 = vector.load %arg2[%c0_3, %c0_4] : memref<128x1xf32, #tpu.memory_space<vmem>>, vector<128x1xf32>
    %6 = vector.broadcast %5 : vector<128x1xf32> to vector<128x128xf32>
    %7 = arith.mulf %4, %6 : vector<128x128xf32>
    %c128_i32 = arith.constant 128 : i32
    %8 = arith.muli %arg0, %c128_i32 : i32
    %9 = tpu.assume_multiple %8, 128 : i32
    %10 = arith.index_cast %9 : i32 to index
    %c0_5 = arith.constant 0 : index
    %11 = vector.load %arg3[%10, %c0_5] : memref<256x128xbf16, #tpu.memory_space<vmem>>, vector<128x128xbf16>
    %c0_6 = arith.constant 0 : index
    %c0_7 = arith.constant 0 : index
    %12 = vector.load %arg4[%c0_6, %c0_7] : memref<128x128xbf16, #tpu.memory_space<vmem>>, vector<128x128xbf16>
    %cst_8 = arith.constant dense<0.000000e+00> : vector<128x128xf32>
    %13 = tpu.matmul %11, %12, %cst_8 {dimension_numbers = #tpu.dot_dimension_numbers<[1], [0], [0], [1], [0, 0, 1, 1], [], []>} : vector<128x128xbf16>, vector<128x128xbf16>, vector<128x128xf32> -> vector<128x128xf32>
    %14 = arith.truncf %7 : vector<128x128xf32> to vector<128x128xbf16>
    %c0_9 = arith.constant 0 : index
    %c0_10 = arith.constant 0 : index
    %15 = vector.load %arg5[%c0_9, %c0_10] : memref<128x128xbf16, #tpu.memory_space<vmem>>, vector<128x128xbf16>
    %cst_11 = arith.constant dense<0.000000e+00> : vector<128x128xf32>
    %16 = tpu.matmul %14, %15, %cst_11 {dimension_numbers = #tpu.dot_dimension_numbers<[1], [0], [0], [1], [0, 0, 1, 1], [], []>} : vector<128x128xbf16>, vector<128x128xbf16>, vector<128x128xf32> -> vector<128x128xf32>
    %17 = arith.addf %13, %16 : vector<128x128xf32>
    %c0_12 = arith.constant 0 : index
    %c0_13 = arith.constant 0 : index
    %18 = vector.load %arg6[%c0_12, %c0_13] : memref<1x128xf32, #tpu.memory_space<vmem>>, vector<1x128xf32>
    %19 = vector.broadcast %18 : vector<1x128xf32> to vector<128x128xf32>
    %20 = arith.addf %17, %19 : vector<128x128xf32>
    %cst_14 = arith.constant 0.000000e+00 : f32
    %21 = vector.broadcast %cst_14 : f32 to vector<128x128xf32>
    %22 = arith.maximumf %20, %21 : vector<128x128xf32>
    %23 = arith.truncf %22 : vector<128x128xf32> to vector<128x128xbf16>
    %c0_15 = arith.constant 0 : index
    %c0_16 = arith.constant 0 : index
    %24 = vector.load %arg7[%c0_15, %c0_16] : memref<128x128xbf16, #tpu.memory_space<vmem>>, vector<128x128xbf16>
    tpu.vector_store %arg7[%c0_15, %c0_16], %23 {strides = array<i32>} : memref<128x128xbf16, #tpu.memory_space<vmem>>, vector<128x128xbf16>,
    return
  }
  func.func @transform_0(%arg0: i32) -> (i32, i32) {
    %c0_i32 = arith.constant 0 : i32
    %c0_i32_0 = arith.constant 0 : i32
    return %arg0, %c0_i32 : i32, i32
  }
  func.func @transform_1(%arg0: i32) -> (i32, i32) {
    %c0_i32 = arith.constant 0 : i32
    %c0_i32_0 = arith.constant 0 : i32
    return %arg0, %c0_i32 : i32, i32
  }
  func.func @transform_2(%arg0: i32) -> (i32, i32) {
    %c0_i32 = arith.constant 0 : i32
    %c0_i32_0 = arith.constant 0 : i32
    %c0_i32_1 = arith.constant 0 : i32
    return %c0_i32, %c0_i32_0 : i32, i32
  }
  func.func @transform_3(%arg0: i32) -> (i32, i32) {
    %c0_i32 = arith.constant 0 : i32
    %c0_i32_0 = arith.constant 0 : i32
    %c0_i32_1 = arith.constant 0 : i32
    return %c0_i32, %c0_i32_0 : i32, i32
  }
  func.func @transform_4(%arg0: i32) -> (i32, i32) {
    %c0_i32 = arith.constant 0 : i32
    %c0_i32_0 = arith.constant 0 : i32
    %c0_i32_1 = arith.constant 0 : i32
    return %c0_i32, %c0_i32_0 : i32, i32
  }
  func.func @transform_5(%arg0: i32) -> (i32, i32) {
    %c0_i32 = arith.constant 0 : i32
    %c0_i32_0 = arith.constant 0 : i32
    %c0_i32_1 = arith.constant 0 : i32
    return %c0_i32, %c0_i32_0 : i32, i32
  }
  func.func @transform_6(%arg0: i32) -> (i32, i32) {
    %c0_i32 = arith.constant 0 : i32
    %c0_i32_0 = arith.constant 0 : i32
    return %arg0, %c0_i32 : i32, i32
  }
}

</mosaic_0001>

<bundles_post_ra>
// kernel: sage_forward.4
= control target key start
LH: loop header
LB: loop body
LE: loop exit
PB: predicated region body
PF: predicated region fallthrough
CT: control target
= control target key end

     0   :  { %s1468_s21 = smov 0   ;;  %s1665_s0 = inlined_call_operand.vmem [shape: s8[256,256], index: 0, kind: input, shape index: {}]   ;;  %s1666_s1 = inlined_call_operand.vmem [shape: f32[256,1], index: 1, kind: input, shape index: {}]   ;;  %s1667_s2 = inlined_call_operand.vmem [shape: bf16[256,128], index: 2, kind: input, shape index: {}]   ;;  %s1668_s3 = inlined_call_operand.vmem [shape: bf16[128,128], index: 3, kind: input, shape index: {}]   ;;  %s1669_s4 = inlined_call_operand.vmem [shape: bf16[128,128], index: 4, kind: input, shape index: {}]   ;;  %s1670_s5 = inlined_call_operand.vmem [shape: f32[1,128], index: 5, kind: input, shape index: {}]   ;;  %s1671_s6 = inlined_call_operand.vmem [shape: bf16[256,128], index: 6, kind: output, shape index: {}]  }
   0x1 LB: > { %s1474_s22 = sadd.s32 4294967295, %s1430_s21   ;;  %p1151_p0 = scmp.ge.s32.totalorder %s1430_s21, 1  ;;  %s1430_s21 = sphi %s1468_s21, %s16_s21  }
   0x2   : > { %p225_p1 = scmp.lt.s32.totalorder %s1430_s21, 3 }
   0x4   : > { %p226_p2 = pnand %p1151_p0, %p225_p1 }
   0x5   : > { %s1155_s27 = sshll.u32 (!%p226_p2), %s1474_s22, 4  ;;  %s1152_s28 = sshll.u32 (!%p226_p2), %s1474_s22, 2 }
   0x6   : > { %229 = sbr.rel (%p226_p2) target bundleno = 445 (0x1bd), region = 44  ;;  %p269_p3 = scmp.lt.s32.totalorder (!%p226_p2), %s1155_s27, 31 }
   0x7   : > { %p262_p4 = scmp.lt.s32.totalorder (!%p226_p2), %s1152_s28, 7  ;;  %s1223_s17 = sshll.u32 (!%p226_p2), %s1474_s22, 7 }
   0xb   : > { %v1331_v0 = vld [vmem:[%s1667_s2 + $0x38] sm:$0xff]  ;;  %v1432_v2 = vmov 0   ;;  %v1330_v3 = vld [vmem:[%s1667_s2 + $0x30] sm:$0xff]  ;;  %s1673_s27 = smov (!%p269_p3, %s1155_s27), 31  ;;  %v1329_v5 = vld [vmem:[%s1667_s2 + $0x28] sm:$0xff]  ;;  %s1675_s28 = smov (!%p262_p4, %s1152_s28), 7 }
   0xc   : > { %v1339_v1 = vld [vmem:[%s1667_s2 + $0x78] sm:$0xff]  ;;  %1420 = vset.pattern.permute.xlu0 %v1432_v2  ;;  %1421 = vset.pattern.permute.xlu1 %v1432_v2  ;;  %v1338_v4 = vld [vmem:[%s1667_s2 + $0x70] sm:$0xff]  ;;  %s1156_s9 = sshll.u32 %s1673_s27, 3  ;;  %v1337_v6 = vld [vmem:[%s1667_s2 + $0x68] sm:$0xff]  ;;  %s1323_s23 = sshll.u32 %s1675_s28, 4 }
   0xd   : > { %496 = vmatpush.bf16.msra.mxu0 %v1331_v0  ;;  %545 = vmatpush.bf16.msra.mxu1 %v1339_v1  ;;  %s1498_s12 = scalar_lea.vmem %s1666_s1, %s1156_s9  ;;  %v1328_v9 = vld [vmem:[%s1667_s2 + $0x20] sm:$0xff]  ;;  %v1327_v12 = vld [vmem:[%s1667_s2 + $0x18] sm:$0xff]  ;;  %s1525_s8 = scalar_lea.vmem %s1665_s0, %s1323_s23  ;;  %v1326_v15 = vld [vmem:[%s1667_s2 + $0x10] sm:$0xff] }
   0xe   : > { %1422 = vset.pattern.permute.xlu2 %v1432_v2  ;;  %v594_v7 = vld [vmem:[%s1498_s12] sm:$0xff]  ;;  %v596_v8 = vld [vmem:[%s1498_s12 + $0x10] sm:$0xff]  ;;  %v595_v11 = vld [vmem:[%s1498_s12 + $0x8] sm:$0xff]  ;;  %s1158_s19 = sshll.u32 %s1673_s27, 2 }
   0xf   : > { %612 = vperm.xlu0 %1420, %v594_v7   ;;  %622 = vperm.xlu1 %1421, %v596_v8   ;;  %v1336_v10 = vld [vmem:[%s1667_s2 + $0x60] sm:$0xff]  ;;  %v1335_v13 = vld [vmem:[%s1667_s2 + $0x58] sm:$0xff]  ;;  %v1334_v16 = vld [vmem:[%s1667_s2 + $0x50] sm:$0xff] }
  0x10   : > { %v597_v14 = vld [vmem:[%s1498_s12 + $0x18] sm:$0xff]  ;;  %v280_v17 = vld [vmem:[%s1525_s8] sm:$0xff]  ;;  %v281_v18 = vld [vmem:[%s1525_s8 + $0x8] sm:$0xff] }
  0x11   : > { %497 = vmatpush.bf16.msra.mxu0 %v1330_v3  ;;  %546 = vmatpush.bf16.msra.mxu1 %v1338_v4  ;;  %v600_v19 = vld [vmem:[%s1498_s12 + $0x30] sm:$0xff]  ;;  %v288_v20 = vunpack.c.0.s8 %v280_v17  ;;  %v290_v21 = vunpack.c.1.s8 %v280_v17  ;;  %v289_v22 = vunpack.c.0.s8 %v281_v18  ;;  %v291_v23 = vunpack.c.1.s8 %v281_v18  ;;  %v1325_v24 = vld [vmem:[%s1667_s2 + $0x8] sm:$0xff]  ;;  %v601_v26 = vld [vmem:[%s1498_s12 + $0x38] sm:$0xff] }
  0x12   : > { %v1333_v25 = vld [vmem:[%s1667_s2 + $0x48] sm:$0xff]  ;;  %v1324_v31 = vld [vmem:[%s1667_s2] sm:$0xff]  ;;  %v604_v36 = vld [vmem:[%s1498_s12 + $0x50] sm:$0xff]  ;;  %v292_v39 = vunpack.c.2.s8 %v280_v17  ;;  %v294_v40 = vunpack.c.3.s8 %v280_v17  ;;  %v293_v41 = vunpack.c.2.s8 %v281_v18  ;;  %v295_v42 = vunpack.c.3.s8 %v281_v18 }
  0x13   : > { %v320_v27 = vcvt.s32.f32 %v288_v20  ;;  %v322_v28 = vcvt.s32.f32 %v290_v21  ;;  %v321_v29 = vcvt.s32.f32 %v289_v22  ;;  %v323_v30 = vcvt.s32.f32 %v291_v23  ;;  %v1332_v32 = vld [vmem:[%s1667_s2 + $0x40] sm:$0xff]  ;;  %v603_v33 = vld [vmem:[%s1498_s12 + $0x48] sm:$0xff]  ;;  %v609_v49 = vld [vmem:[%s1498_s12 + $0x78] sm:$0xff] }
  0x14   : > { %v598_v37 = vld [vmem:[%s1498_s12 + $0x20] sm:$0xff]  ;;  %v607_v43 = vld [vmem:[%s1498_s12 + $0x68] sm:$0xff]  ;;  %v324_v45 = vcvt.s32.f32 %v292_v39  ;;  %v326_v46 = vcvt.s32.f32 %v294_v40  ;;  %v325_v47 = vcvt.s32.f32 %v293_v41  ;;  %v327_v48 = vcvt.s32.f32 %v295_v42  ;;  %v282_v53 = vld [vmem:[%s1525_s8 + $0x10] sm:$0xff] }
  0x15   : > { %498 = vmatpush.bf16.msra.mxu0 %v1329_v5  ;;  %547 = vmatpush.bf16.msra.mxu1 %v1337_v6  ;;  %v352_v34 = vpack.c.bf16 %v322_v28, %v320_v27  ;;  %v353_v35 = vpack.c.bf16 %v323_v30, %v321_v29  ;;  %v606_v38 = vld [vmem:[%s1498_s12 + $0x60] sm:$0xff]  ;;  %v599_v44 = vld [vmem:[%s1498_s12 + $0x28] sm:$0xff]  ;;  %v283_v54 = vld [vmem:[%s1525_s8 + $0x18] sm:$0xff]  ;;  %v296_v55 = vunpack.c.0.s8 %v282_v53  ;;  %v298_v56 = vunpack.c.1.s8 %v282_v53 }
  0x16   : > { %632 = vperm.xlu2 %1422, %v598_v37   ;;  %v354_v50 = vpack.c.bf16 %v326_v46, %v324_v45  ;;  %v355_v51 = vpack.c.bf16 %v327_v48, %v325_v47  ;;  %v602_v52 = vld [vmem:[%s1498_s12 + $0x40] sm:$0xff]  ;;  %v297_v57 = vunpack.c.0.s8 %v283_v54  ;;  %v299_v58 = vunpack.c.1.s8 %v283_v54  ;;  %v605_v59 = vld [vmem:[%s1498_s12 + $0x58] sm:$0xff]  ;;  %v608_v2 = vld [vmem:[%s1498_s12 + $0x70] sm:$0xff]  ;;  %s707_s12 = sshra.s32 %s1223_s17, 3 }
  0x17   : > { %617 = vperm.xlu0 %1420, %v595_v11   ;;  %627 = vperm.xlu1 %1421, %v597_v14   ;;  %v328_v60 = vcvt.s32.f32 %v296_v55  ;;  %v330_v61 = vcvt.s32.f32 %v298_v56  ;;  %v300_v3 = vunpack.c.2.s8 %v282_v53  ;;  %v302_v4 = vunpack.c.3.s8 %v282_v53  ;;  %v285_v14 = vld [vmem:[%s1525_s8 + $0x28] sm:$0xff]  ;;  %v1354_v30 = vld [vmem:[%s1668_s3 + $0x30] sm:$0xff]  ;;  %v1352_v40 = vld [vmem:[%s1668_s3 + $0x20] sm:$0xff]  ;;  %s1224_s26 = sshll.u32 %s707_s12, 2  ;;  %s1638_s12 = scalar_lea.vmem %s1671_s6, %s1158_s19 }
  0x18   : > { %v329_v62 = vcvt.s32.f32 %v297_v57  ;;  %v331_v63 = vcvt.s32.f32 %v299_v58  ;;  %v301_v5 = vunpack.c.2.s8 %v283_v54  ;;  %v303_v6 = vunpack.c.3.s8 %v283_v54  ;;  %v1362_v39 = vld [vmem:[%s1669_s4 + $0x30] sm:$0xff]  ;;  %v287_v42 = vld [vmem:[%s1525_s8 + $0x38] sm:$0xff]  ;;  %v1349_v56 = vld [vmem:[%s1668_s3 + $0x8] sm:$0xff]  ;;  %s1605_s7 = scalar_lea.vmem %s1667_s2, %s1224_s26 }
  0x19   : > { %499 = vmatpush.bf16.msra.mxu0 %v1328_v9  ;;  %548 = vmatpush.bf16.msra.mxu1 %v1336_v10  ;;  %v356_v0 = vpack.c.bf16 %v330_v61, %v328_v60  ;;  %v332_v7 = vcvt.s32.f32 %v300_v3  ;;  %v334_v8 = vcvt.s32.f32 %v302_v4  ;;  %v305_v17 = vunpack.c.0.s8 %v285_v14  ;;  %v286_v41 = vld [vmem:[%s1525_s8 + $0x30] sm:$0xff]  ;;  %v1359_v55 = vld [vmem:[%s1669_s4 + $0x18] sm:$0xff]  ;;  %v1348_v60 = vld [vmem:[%s1668_s3] sm:$0xff] }
  0x1a   : > { %v357_v1 = vpack.c.bf16 %v331_v63, %v329_v62  ;;  %v333_v9 = vcvt.s32.f32 %v301_v5  ;;  %v335_v10 = vcvt.s32.f32 %v303_v6  ;;  %v307_v18 = vunpack.c.1.s8 %v285_v14  ;;  %v1340_v61 = vld [vmem:[%s1605_s7] sm:$0xff]  ;;  %v1357_v62 = vld [vmem:[%s1669_s4 + $0x8] sm:$0xff] }
  0x1b   : > { %v358_v11 = vpack.c.bf16 %v334_v8, %v332_v7  ;;  %v337_v21 = vcvt.s32.f32 %v305_v17  ;;  %v309_v28 = vunpack.c.2.s8 %v285_v14  ;;  %v311_v29 = vunpack.c.3.s8 %v285_v14  ;;  %v1356_v3 = vld [vmem:[%s1669_s4] sm:$0xff]  ;;  %v1342_v14 = vld [vmem:[%s1605_s7 + $0x10] sm:$0xff] }
  0x1c   : > { %v339_v22 = vcvt.s32.f32 %v307_v18  ;;  %v312_v45 = vunpack.c.0.s8 %v286_v41  ;;  %v314_v46 = vunpack.c.1.s8 %v286_v41  ;;  %v313_v47 = vunpack.c.0.s8 %v287_v42 }
  0x1d   : > { %500 = vmatpush.bf16.msra.mxu0 %v1327_v12  ;;  %549 = vmatpush.bf16.msra.mxu1 %v1335_v13  ;;  %v359_v12 = vpack.c.bf16 %v335_v10, %v333_v9  ;;  %v284_v13 = vld [vmem:[%s1525_s8 + $0x20] sm:$0xff]  ;;  %v315_v48 = vunpack.c.1.s8 %v287_v42  ;;  %v316_v63 = vunpack.c.2.s8 %v286_v41  ;;  %v1341_v10 = vld [vmem:[%s1605_s7 + $0x8] sm:$0xff] }
  0x1e   : > { %637 = vperm.xlu2 %1422, %v599_v44   ;;  %v310_v27 = vunpack.c.3.s8 %v284_v13  ;;  %v1351_v44 = vld [vmem:[%s1668_s3 + $0x18] sm:$0xff]  ;;  %v345_v53 = vcvt.s32.f32 %v313_v47 }
  0x1f   : > { %642 = vperm.xlu0 %1420, %v600_v19   ;;  %647 = vperm.xlu1 %1421, %v601_v26   ;;  %v308_v26 = vunpack.c.2.s8 %v284_v13  ;;  %v347_v54 = vcvt.s32.f32 %v315_v48  ;;  %v348_v4 = vcvt.s32.f32 %v316_v63 }
  0x21   : > { %501 = vmatpush.bf16.msra.mxu0 %v1326_v15  ;;  %550 = vmatpush.bf16.msra.mxu1 %v1334_v16  ;;  %v304_v15 = vunpack.c.0.s8 %v284_v13  ;;  %v306_v16 = vunpack.c.1.s8 %v284_v13  ;;  %v365_v58 = vpack.c.bf16 %v347_v54, %v345_v53 }
  0x23   : > { %v336_v19 = vcvt.s32.f32 %v304_v15  ;;  %v338_v20 = vcvt.s32.f32 %v306_v16 }
  0x25   : > { %502 = vmatpush.bf16.msra.mxu0 %v1325_v24  ;;  %551 = vmatpush.bf16.msra.mxu1 %v1333_v25  ;;  %v360_v23 = vpack.c.bf16 %v338_v20, %v336_v19  ;;  %v361_v24 = vpack.c.bf16 %v339_v22, %v337_v21  ;;  %v1355_v25 = vld [vmem:[%s1668_s3 + $0x38] sm:$0xff] }
  0x26   : > { %652 = vperm.xlu2 %1422, %v602_v52   ;;  %960 = vmatpush.bf16.msra.mxu3 %v1355_v25  ;;  %v346_v52 = vcvt.s32.f32 %v314_v46 }
  0x27   : > { %657 = vperm.xlu0 %1420, %v603_v33   ;;  %662 = vperm.xlu1 %1421, %v604_v36   ;;  %v341_v33 = vcvt.s32.f32 %v309_v28  ;;  %v1353_v36 = vld [vmem:[%s1668_s3 + $0x28] sm:$0xff] }
  0x29   : > { %503 = vmatpush.bf16.msra.mxu0 %v1324_v31  ;;  %552 = vmatpush.bf16.msra.mxu1 %v1332_v32  ;;  %v340_v31 = vcvt.s32.f32 %v308_v26  ;;  %v342_v32 = vcvt.s32.f32 %v310_v27  ;;  %v1343_v26 = vld [vmem:[%s1605_s7 + $0x18] sm:$0xff] }
  0x2a   : > { %961 = vmatpush.bf16.msra.mxu3 %v1354_v30 }
  0x2b   : > { %v362_v37 = vpack.c.bf16 %v342_v32, %v340_v31 }
  0x2c   : > { %504 = vmatmul.bf16.vlgmr.msra.gmra.mxu0 %v352_v34  ;;  %553 = vmatmul.bf16.vlgmr.msra.gmra.mxu1 %v353_v35  ;;  %v343_v34 = vcvt.s32.f32 %v311_v29  ;;  %v1363_v35 = vld [vmem:[%s1669_s4 + $0x38] sm:$0xff] }
  0x2d   : > { %815 = vmatpush.bf16.msra.mxu2 %v1363_v35 }
  0x2e   : > { %667 = vperm.xlu2 %1422, %v605_v59   ;;  %962 = vmatpush.bf16.msra.mxu3 %v1353_v36  ;;  %v1358_v59 = vld [vmem:[%s1669_s4 + $0x10] sm:$0xff] }
  0x2f   : > { %672 = vperm.xlu0 %1420, %v606_v38   ;;  %677 = vperm.xlu1 %1421, %v607_v43   ;;  %v363_v38 = vpack.c.bf16 %v343_v34, %v341_v33  ;;  %v1361_v43 = vld [vmem:[%s1669_s4 + $0x28] sm:$0xff] }
  0x31   : > { %816 = vmatpush.bf16.msra.mxu2 %v1362_v39 }
  0x32   : > { %963 = vmatpush.bf16.msra.mxu3 %v1352_v40 }
  0x35   : > { %817 = vmatpush.bf16.msra.mxu2 %v1361_v43 }
  0x36   : > { %682 = vperm.xlu2 %1422, %v608_v2   ;;  %964 = vmatpush.bf16.msra.mxu3 %v1351_v44  ;;  %v319_v2 = vunpack.c.3.s8 %v287_v42 }
  0x37   : > { %687 = vperm.xlu0 %1420, %v609_v49   ;;  %v1360_v49 = vld [vmem:[%s1669_s4 + $0x20] sm:$0xff] }
  0x38   : > { %v351_v7 = vcvt.s32.f32 %v319_v2 }
  0x39   : > { %818 = vmatpush.bf16.msra.mxu2 %v1360_v49  ;;  %v1345_v49 = vld [vmem:[%s1605_s7 + $0x28] sm:$0xff] }
  0x3c   : > { %509 = vmatmul.bf16.gmra.mxu0 %v354_v50  ;;  %558 = vmatmul.bf16.gmra.mxu1 %v355_v51  ;;  %v1350_v50 = vld [vmem:[%s1668_s3 + $0x10] sm:$0xff]  ;;  %v344_v51 = vcvt.s32.f32 %v312_v45 }
  0x3d   : > { %965 = vmatpush.bf16.msra.mxu3 %v1350_v50  ;;  %819 = vmatpush.bf16.msra.mxu2 %v1359_v55 }
  0x3e   : > { %v364_v57 = vpack.c.bf16 %v346_v52, %v344_v51 }
  0x41   : > { %966 = vmatpush.bf16.msra.mxu3 %v1349_v56  ;;  %820 = vmatpush.bf16.msra.mxu2 %v1358_v59 }
  0x45   : > { %967 = vmatpush.bf16.msra.mxu3 %v1348_v60  ;;  %821 = vmatpush.bf16.msra.mxu2 %v1357_v62 }
  0x48   : > { %968 = vmatmul.bf16.vlgmr.msra.gmra.mxu3 %v1340_v61  ;;  %v1346_v61 = vld [vmem:[%s1605_s7 + $0x30] sm:$0xff] }
  0x49   : > { %822 = vmatpush.bf16.msra.mxu2 %v1356_v3 }
  0x4c   : > { %514 = vmatmul.bf16.gmra.mxu0 %v356_v0  ;;  %563 = vmatmul.bf16.gmra.mxu1 %v357_v1  ;;  %v318_v0 = vunpack.c.3.s8 %v286_v41  ;;  %v317_v1 = vunpack.c.2.s8 %v287_v42 }
  0x4e   : > { %v350_v5 = vcvt.s32.f32 %v318_v0  ;;  %v349_v6 = vcvt.s32.f32 %v317_v1 }
  0x50   : > { %v366_v8 = vpack.c.bf16 %v350_v5, %v348_v4  ;;  %v367_v9 = vpack.c.bf16 %v351_v7, %v349_v6 }
  0x58   : > { %973 = vmatmul.bf16.gmra.mxu3 %v1341_v10 }
  0x5c   : > { %519 = vmatmul.bf16.gmra.mxu0 %v358_v11  ;;  %568 = vmatmul.bf16.gmra.mxu1 %v359_v12 }
  0x68   : > { %978 = vmatmul.bf16.gmra.mxu3 %v1342_v14 }
  0x6c   : > { %524 = vmatmul.bf16.gmra.mxu0 %v360_v23  ;;  %573 = vmatmul.bf16.gmra.mxu1 %v361_v24 }
  0x70   : > { %v633_v35 = vpop.permute.xlu2 %632 }
  0x78   : > { %983 = vmatmul.bf16.gmra.mxu3 %v1343_v26  ;;  %v638_v43 = vpop.permute.xlu2 %637 }
  0x7c   : > { %529 = vmatmul.bf16.gmra.mxu0 %v362_v37  ;;  %578 = vmatmul.bf16.gmra.mxu1 %v363_v38  ;;  %v1344_v38 = vld [vmem:[%s1605_s7 + $0x20] sm:$0xff] }
  0x80   : > { %v653_v3 = vpop.permute.xlu2 %652 }
  0x81   : > { %v613_v11 = vpop.permute.xlu0 %612  ;;  %v623_v23 = vpop.permute.xlu1 %622 }
  0x88   : > { %988 = vmatmul.bf16.gmra.mxu3 %v1344_v38 }
  0x89   : > { %v618_v19 = vpop.permute.xlu0 %617  ;;  %v628_v31 = vpop.permute.xlu1 %627 }
  0x8c   : > { %534 = vmatmul.bf16.gmra.mxu0 %v364_v57  ;;  %583 = vmatmul.bf16.gmra.mxu1 %v365_v58 }
  0x91   : > { %v643_v54 = vpop.permute.xlu0 %642  ;;  %v648_v55 = vpop.permute.xlu1 %647 }
  0x98   : > { %993 = vmatmul.bf16.gmra.mxu3 %v1345_v49 }
  0x99   : > { %v658_v2 = vpop.permute.xlu0 %657  ;;  %v663_v14 = vpop.permute.xlu1 %662 }
  0x9c   : > { %539 = vmatmul.bf16.gmra.mxu0 %v366_v8  ;;  %588 = vmatmul.bf16.gmra.mxu1 %v367_v9  ;;  %v1347_v9 = vld [vmem:[%s1605_s7 + $0x38] sm:$0xff] }
  0xa1   : > { %v678_v26 = vpop.permute.xlu1 %677 }
  0xa8   : > { %998 = vmatmul.bf16.gmra.mxu3 %v1346_v61 }
  0xa9   : > { %v505_v12 = vpop.f32.mrf.mxu0  ;;  %v554_v13 = vpop.f32.mrf.mxu1 }
  0xaa   : > { %v555_v15 = vadd.f32 %v554_v13, %v505_v12 }
  0xac   : > { %v690_v20 = vmul.f32 %v613_v11, %v555_v15  ;;  %v668_v15 = vpop.permute.xlu2 %667 }
  0xb1   : > { %v507_v16 = vpop.f32.mrf.mxu0  ;;  %v556_v17 = vpop.f32.mrf.mxu1 }
  0xb2   : > { %v557_v18 = vadd.f32 %v556_v17, %v507_v16 }
  0xb4   : > { %v691_v21 = vmul.f32 %v618_v19, %v557_v18  ;;  %v683_v38 = vpop.permute.xlu2 %682 }
  0xb6   : > { %v743_v22 = vpack.c.bf16 %v691_v21, %v690_v20 }
  0xb8   : > { %823 = vmatmul.bf16.vlgmr.msra.gmra.mxu2 %v743_v22  ;;  %1003 = vmatmul.bf16.gmra.mxu3 %v1347_v9 }
  0xb9   : > { %v510_v24 = vpop.f32.mrf.mxu0  ;;  %v559_v25 = vpop.f32.mrf.mxu1 }
  0xba   : > { %v560_v27 = vadd.f32 %v559_v25, %v510_v24  ;;  %v673_v25 = vpop.permute.xlu0 %672 }
  0xbc   : > { %v692_v32 = vmul.f32 %v623_v23, %v560_v27 }
  0xc1   : > { %v512_v28 = vpop.f32.mrf.mxu0  ;;  %v561_v29 = vpop.f32.mrf.mxu1 }
  0xc2   : > { %v562_v30 = vadd.f32 %v561_v29, %v512_v28 }
  0xc4   : > { %v693_v33 = vmul.f32 %v628_v31, %v562_v30 }
  0xc6   : > { %v744_v34 = vpack.c.bf16 %v693_v33, %v692_v32 }
  0xc8   : > { %828 = vmatmul.bf16.gmra.mxu2 %v744_v34 }
  0xc9   : > { %v515_v36 = vpop.f32.mrf.mxu0  ;;  %v564_v37 = vpop.f32.mrf.mxu1 }
  0xca   : > { %v565_v39 = vadd.f32 %v564_v37, %v515_v36  ;;  %v688_v37 = vpop.permute.xlu0 %687 }
  0xcb   : > { %v969_v32 = vpop.f32.mrf.mxu3 }
  0xcc   : > { %v694_v44 = vmul.f32 %v633_v35, %v565_v39 }
  0xd1   : > { %v517_v40 = vpop.f32.mrf.mxu0  ;;  %v566_v41 = vpop.f32.mrf.mxu1 }
  0xd2   : > { %v567_v42 = vadd.f32 %v566_v41, %v517_v40 }
  0xd4   : > { %v695_v45 = vmul.f32 %v638_v43, %v567_v42  ;;  %v971_v42 = vpop.f32.mrf.mxu3 }
  0xd6   : > { %v745_v46 = vpack.c.bf16 %v695_v45, %v694_v44 }
  0xd8   : > { %833 = vmatmul.bf16.gmra.mxu2 %v745_v46 }
  0xd9   : > { %v520_v47 = vpop.f32.mrf.mxu0  ;;  %v569_v48 = vpop.f32.mrf.mxu1 }
  0xda   : > { %v570_v50 = vadd.f32 %v569_v48, %v520_v47  ;;  %v1630_v47 = vld [vmem:[%s1670_s5] ss:$0 sm:$0xff] }
  0xdc   : > { %v696_v56 = vmul.f32 %v643_v54, %v570_v50  ;;  %v974_v43 = vpop.f32.mrf.mxu3 }
  0xe1   : > { %v522_v51 = vpop.f32.mrf.mxu0  ;;  %v571_v52 = vpop.f32.mrf.mxu1 }
  0xe2   : > { %v572_v53 = vadd.f32 %v571_v52, %v522_v51 }
  0xe4   : > { %v697_v57 = vmul.f32 %v648_v55, %v572_v53  ;;  %v976_v45 = vpop.f32.mrf.mxu3 }
  0xe6   : > { %v746_v58 = vpack.c.bf16 %v697_v57, %v696_v56 }
  0xe8   : > { %838 = vmatmul.bf16.gmra.mxu2 %v746_v58 }
  0xe9   : > { %v525_v59 = vpop.f32.mrf.mxu0  ;;  %v574_v60 = vpop.f32.mrf.mxu1 }
  0xea   : > { %v575_v62 = vadd.f32 %v574_v60, %v525_v59 }
  0xec   : > { %v698_v4 = vmul.f32 %v653_v3, %v575_v62  ;;  %v979_v51 = vpop.f32.mrf.mxu3 }
  0xf1   : > { %v527_v63 = vpop.f32.mrf.mxu0  ;;  %v576_v0 = vpop.f32.mrf.mxu1 }
  0xf2   : > { %v577_v1 = vadd.f32 %v576_v0, %v527_v63 }
  0xf4   : > { %v699_v5 = vmul.f32 %v658_v2, %v577_v1  ;;  %v981_v57 = vpop.f32.mrf.mxu3 }
  0xf6   : > { %v747_v6 = vpack.c.bf16 %v699_v5, %v698_v4 }
  0xf8   : > { %843 = vmatmul.bf16.gmra.mxu2 %v747_v6 }
  0xf9   : > { %v530_v7 = vpop.f32.mrf.mxu0  ;;  %v579_v8 = vpop.f32.mrf.mxu1 }
  0xfa   : > { %v580_v10 = vadd.f32 %v579_v8, %v530_v7 }
  0xfc   : > { %v700_v16 = vmul.f32 %v663_v14, %v580_v10  ;;  %v984_v1 = vpop.f32.mrf.mxu3 }
 0x101   : > { %v532_v11 = vpop.f32.mrf.mxu0  ;;  %v581_v12 = vpop.f32.mrf.mxu1 }
 0x102   : > { %v582_v13 = vadd.f32 %v581_v12, %v532_v11 }
 0x104   : > { %v701_v17 = vmul.f32 %v668_v15, %v582_v13  ;;  %v986_v6 = vpop.f32.mrf.mxu3 }
 0x106   : > { %v748_v18 = vpack.c.bf16 %v701_v17, %v700_v16 }
 0x108   : > { %848 = vmatmul.bf16.gmra.mxu2 %v748_v18 }
 0x109   : > { %v535_v19 = vpop.f32.mrf.mxu0  ;;  %v584_v20 = vpop.f32.mrf.mxu1 }
 0x10a   : > { %v585_v21 = vadd.f32 %v584_v20, %v535_v19 }
 0x10c   : > { %v702_v27 = vmul.f32 %v673_v25, %v585_v21  ;;  %v989_v14 = vpop.f32.mrf.mxu3 }
 0x111   : > { %v537_v22 = vpop.f32.mrf.mxu0  ;;  %v586_v23 = vpop.f32.mrf.mxu1 }
 0x112   : > { %v587_v24 = vadd.f32 %v586_v23, %v537_v22 }
 0x114   : > { %v703_v28 = vmul.f32 %v678_v26, %v587_v24  ;;  %v991_v20 = vpop.f32.mrf.mxu3 }
 0x116   : > { %v749_v29 = vpack.c.bf16 %v703_v28, %v702_v27 }
 0x118   : > { %853 = vmatmul.bf16.gmra.mxu2 %v749_v29 }
 0x119   : > { %v540_v30 = vpop.f32.mrf.mxu0  ;;  %v589_v31 = vpop.f32.mrf.mxu1 }
 0x11a   : > { %v590_v33 = vadd.f32 %v589_v31, %v540_v30 }
 0x11c   : > { %v704_v39 = vmul.f32 %v683_v38, %v590_v33  ;;  %v994_v26 = vpop.f32.mrf.mxu3 }
 0x121   : > { %v542_v34 = vpop.f32.mrf.mxu0  ;;  %v591_v35 = vpop.f32.mrf.mxu1 }
 0x122   : > { %v592_v36 = vadd.f32 %v591_v35, %v542_v34 }
 0x124   : > { %v705_v40 = vmul.f32 %v688_v37, %v592_v36  ;;  %v996_v35 = vpop.f32.mrf.mxu3 }
 0x126   : > { %v750_v41 = vpack.c.bf16 %v705_v40, %v704_v39 }
 0x128   : > { %858 = vmatmul.bf16.gmra.mxu2 %v750_v41 }
 0x12c   : > { %v999_v40 = vpop.f32.mrf.mxu3 }
 0x13b   : > { %v824_v44 = vpop.f32.mrf.mxu2 }
 0x13c   : > { %v970_v46 = vadd.f32 %v969_v32, %v824_v44 }
 0x13e   : > { %v1013_v49 = vadd.f32 %v1630_v47, %v970_v46  ;;  %v1001_v46 = vpop.f32.mrf.mxu3 }
 0x140   : > { %v1029_v53 = vmax.f32 %v1013_v49, 0.0 }
 0x143   : > { %v826_v48 = vpop.f32.mrf.mxu2 }
 0x144   : > { %v972_v50 = vadd.f32 %v971_v42, %v826_v48 }
 0x146   : > { %v1014_v52 = vadd.f32 %v1630_v47, %v972_v50 }
 0x148   : > { %v1030_v54 = vmax.f32 %v1014_v52, 0.0 }
 0x14a   : > { %v1367_v55 = vpack.c.bf16 %v1030_v54, %v1029_v53 }
 0x14b   : > { %v829_v56 = vpop.f32.mrf.mxu2 }
 0x14c   : > { %1368 = vst [vmem:[%s1638_s12] sm:$0xff] %v1367_v55   ;;  %v975_v58 = vadd.f32 %v974_v43, %v829_v56  ;;  %v1004_v55 = vpop.f32.mrf.mxu3 }
 0x14e   : > { %v1015_v60 = vadd.f32 %v1630_v47, %v975_v58 }
 0x150   : > { %v1031_v63 = vmax.f32 %v1015_v60, 0.0 }
 0x153   : > { %v831_v59 = vpop.f32.mrf.mxu2 }
 0x154   : > { %v977_v61 = vadd.f32 %v976_v45, %v831_v59  ;;  %v1006_v59 = vpop.f32.mrf.mxu3 }
 0x156   : > { %v1016_v62 = vadd.f32 %v1630_v47, %v977_v61 }
 0x158   : > { %v1032_v0 = vmax.f32 %v1016_v62, 0.0 }
 0x15a   : > { %v1372_v2 = vpack.c.bf16 %v1032_v0, %v1031_v63 }
 0x15b   : > { %v834_v3 = vpop.f32.mrf.mxu2 }
 0x15c   : > { %1404 = vst [vmem:[%s1638_s12 + $0x8] sm:$0xff] %v1372_v2   ;;  %v980_v4 = vadd.f32 %v979_v51, %v834_v3 }
 0x15e   : > { %v1017_v7 = vadd.f32 %v1630_v47, %v980_v4 }
 0x160   : > { %v1033_v10 = vmax.f32 %v1017_v7, 0.0 }
 0x163   : > { %v836_v5 = vpop.f32.mrf.mxu2 }
 0x164   : > { %v982_v8 = vadd.f32 %v981_v57, %v836_v5 }
 0x166   : > { %v1018_v9 = vadd.f32 %v1630_v47, %v982_v8 }
 0x168   : > { %v1034_v11 = vmax.f32 %v1018_v9, 0.0 }
 0x16a   : > { %v1377_v12 = vpack.c.bf16 %v1034_v11, %v1033_v10 }
 0x16b   : > { %v839_v13 = vpop.f32.mrf.mxu2 }
 0x16c   : > { %1405 = vst [vmem:[%s1638_s12 + $0x10] sm:$0xff] %v1377_v12   ;;  %v985_v15 = vadd.f32 %v984_v1, %v839_v13 }
 0x16e   : > { %v1019_v17 = vadd.f32 %v1630_v47, %v985_v15 }
 0x170   : > { %v1035_v21 = vmax.f32 %v1019_v17, 0.0 }
 0x173   : > { %v841_v16 = vpop.f32.mrf.mxu2 }
 0x174   : > { %v987_v18 = vadd.f32 %v986_v6, %v841_v16 }
 0x176   : > { %v1020_v19 = vadd.f32 %v1630_v47, %v987_v18 }
 0x178   : > { %v1036_v22 = vmax.f32 %v1020_v19, 0.0 }
 0x17a   : > { %v1382_v23 = vpack.c.bf16 %v1036_v22, %v1035_v21 }
 0x17b   : > { %v844_v24 = vpop.f32.mrf.mxu2 }
 0x17c   : > { %1406 = vst [vmem:[%s1638_s12 + $0x18] sm:$0xff] %v1382_v23   ;;  %v990_v25 = vadd.f32 %v989_v14, %v844_v24 }
 0x17e   : > { %v1021_v28 = vadd.f32 %v1630_v47, %v990_v25 }
 0x180   : > { %v1037_v31 = vmax.f32 %v1021_v28, 0.0 }
 0x183   : > { %v846_v27 = vpop.f32.mrf.mxu2 }
 0x184   : > { %v992_v29 = vadd.f32 %v991_v20, %v846_v27 }
 0x186   : > { %v1022_v30 = vadd.f32 %v1630_v47, %v992_v29 }
 0x188   : > { %v1038_v32 = vmax.f32 %v1022_v30, 0.0 }
 0x18a   : > { %v1387_v33 = vpack.c.bf16 %v1038_v32, %v1037_v31 }
 0x18b   : > { %v849_v34 = vpop.f32.mrf.mxu2 }
 0x18c   : > { %1407 = vst [vmem:[%s1638_s12 + $0x20] sm:$0xff] %v1387_v33   ;;  %v995_v36 = vadd.f32 %v994_v26, %v849_v34 }
 0x18e   : > { %v1023_v38 = vadd.f32 %v1630_v47, %v995_v36 }
 0x190   : > { %v1039_v42 = vmax.f32 %v1023_v38, 0.0 }
 0x193   : > { %v851_v37 = vpop.f32.mrf.mxu2 }
 0x194   : > { %v997_v39 = vadd.f32 %v996_v35, %v851_v37 }
 0x196   : > { %v1024_v41 = vadd.f32 %v1630_v47, %v997_v39 }
 0x198   : > { %v1040_v43 = vmax.f32 %v1024_v41, 0.0 }
 0x19a   : > { %v1392_v44 = vpack.c.bf16 %v1040_v43, %v1039_v42 }
 0x19b   : > { %v854_v45 = vpop.f32.mrf.mxu2 }
 0x19c   : > { %1408 = vst [vmem:[%s1638_s12 + $0x28] sm:$0xff] %v1392_v44   ;;  %v1000_v48 = vadd.f32 %v999_v40, %v854_v45 }
 0x19e   : > { %v1025_v50 = vadd.f32 %v1630_v47, %v1000_v48 }
 0x1a0   : > { %v1041_v53 = vmax.f32 %v1025_v50, 0.0 }
 0x1a3   : > { %v856_v49 = vpop.f32.mrf.mxu2 }
 0x1a4   : > { %v1002_v51 = vadd.f32 %v1001_v46, %v856_v49 }
 0x1a6   : > { %v1026_v52 = vadd.f32 %v1630_v47, %v1002_v51 }
 0x1a8   : > { %v1042_v54 = vmax.f32 %v1026_v52, 0.0 }
 0x1aa   : > { %v1397_v56 = vpack.c.bf16 %v1042_v54, %v1041_v53 }
 0x1ab   : > { %v859_v57 = vpop.f32.mrf.mxu2 }
 0x1ac   : > { %1409 = vst [vmem:[%s1638_s12 + $0x30] sm:$0xff] %v1397_v56   ;;  %v1005_v58 = vadd.f32 %v1004_v55, %v859_v57 }
 0x1ae   : > { %v1027_v61 = vadd.f32 %v1630_v47, %v1005_v58 }
 0x1b0   : > { %v1043_v0 = vmax.f32 %v1027_v61, 0.0 }
 0x1b3   : > { %v861_v60 = vpop.f32.mrf.mxu2 }
 0x1b4   : > { %v1007_v62 = vadd.f32 %v1006_v59, %v861_v60 }
 0x1b6   : > { %v1028_v63 = vadd.f32 %v1630_v47, %v1007_v62 }
 0x1b8   : > { %v1044_v1 = vmax.f32 %v1028_v63, 0.0 }
 0x1ba   : > { %v1402_v2 = vpack.c.bf16 %v1044_v1, %v1043_v0 }
 0x1bc   : > { %1410 = vst [vmem:[%s1638_s12 + $0x38] sm:$0xff] %v1402_v2  }
 0x1bd PF: > { %s16_s21 = sadd.s32 1, %s1430_s21  }
 0x1be   : > { %p13_p5 = scmp.ge.s32.totalorder %s16_s21, 4  }
 0x1c0   :  { %15 = sbr.rel (!%p13_p5) target bundleno = 1 (0x1), region = 78 }

// kernel: sage_forward.3
= control target key start
LH: loop header
LB: loop body
LE: loop exit
PB: predicated region body
PF: predicated region fallthrough
CT: control target
= control target key end

     0   :  { %11 = vsyncpa [#allocation3], 0  ;;  %s1797_s0 = inlined_call_operand.vmem [shape: s8[256,256], index: 0, kind: input, shape index: {}]   ;;  %s1798_s1 = inlined_call_operand.vmem [shape: f32[256,1], index: 1, kind: input, shape index: {}]   ;;  %s1799_s2 = inlined_call_operand.vmem [shape: bf16[256,128], index: 2, kind: input, shape index: {}]   ;;  %s1800_s3 = inlined_call_operand.hbm [shape: bf16[128,128], index: 3, kind: input, shape index: {}]   ;;  %s1801_s4 = inlined_call_operand.hbm [shape: bf16[128,128], index: 4, kind: input, shape index: {}]   ;;  %s1802_s5 = inlined_call_operand.vmem [shape: f32[1,128], index: 5, kind: input, shape index: {}]   ;;  %s1803_s6 = inlined_call_operand.vmem [shape: bf16[256,128], index: 6, kind: output, shape index: {}]  }
   0x1   :  { %12 = vsyncpa [#allocation5], 0  ;;  %s1623_s21 = smov 0  }
   0x2 LB: > { %s199_s24 = sshll.u32 %s1800_s3, 4  ;;  %s1632_s25 = sadd.s32 4294967295, %s1581_s21   ;;  %s1581_s21 = sphi %s1623_s21, %s18_s21   ;;  %s200_s24 = int_to_ptr.hbm [resolvable:$true] %s199_s24 }
   0x3   : > { %p1205_p0 = scmp.ge.s32.totalorder %s1581_s21, 1  ;;  %p185_p1 = scmp.lt.s32.totalorder %s1581_s21, 3 }
   0x4   : > { %p1486_p2 = scmp.eq.s32.totalorder %s1632_s25, 0  ;;  %s1583_s27 = smov [#allocation2]  }
   0x5   : > { %p1637_p3 = pnand %p1205_p0, %p185_p1  ;;  %s201_s28 = sshll.u32 %s1583_s27, 4  ;;  %s202_s28 = int_to_ptr.vmem [resolvable:$true] %s201_s28 }
   0x6   : > { %s213_s7 = sshll.u32 %s1801_s4, 4  ;;  %s1584_s8 = smov [#allocation4]   ;;  %s214_s7 = int_to_ptr.hbm [resolvable:$true] %s213_s7 }
   0x7   : > { %p1479_p4 = pneg %p1637_p3  ;;  %s215_s9 = sshll.u32 %s1584_s8, 4  ;;  %s216_s9 = int_to_ptr.vmem [resolvable:$true] %s215_s9 }
   0x8   : > { %s1585_s10 = smov 64   ;;  %s1586_s11 = smov 4  }
   0x9   : > { %p1480_p5 = pnand %p1486_p2, %p1479_p4  ;;  %253 = sbr.rel (%p1637_p3) target bundleno = 452 (0x1c4), region = 44 }
   0xb   : > { %1482 = dma.hbm_to_vmem [thread:$0]  (!%p1480_p5), %s200_s24, 1024, %s202_s28, [#allocation3], %s1585_s10, %s1585_s10, %s1586_s11  }
   0xc   : > { %1485 = dma.hbm_to_vmem [thread:$0]  (!%p1480_p5), %s214_s7, 1024, %s216_s9, [#allocation5], %s1585_s10, %s1585_s10, %s1586_s11  }
   0xe   : > { %1572 = dma.done.wait (%p1486_p2), [#allocation3], 1024  }
   0xf   : > { %1574 = vsyncadd (%p1486_p2), [#allocation3], 4294966272 }
  0x10   : > { %1576 = dma.done.wait (%p1486_p2), [#allocation5], 1024  }
  0x11   : > { %1578 = vsyncadd (%p1486_p2), [#allocation5], 4294966272  ;;  %s1215_s12 = sshll.u32 %s1632_s25, 4  ;;  %v1587_v0 = vmov 0   ;;  %v1391_v1 = vld [vmem:[%s1799_s2 + $0x38] sm:$0xff]  ;;  %s1212_s22 = sshll.u32 %s1632_s25, 2 }
  0x12   : > { %1503 = vset.pattern.permute.xlu0 %v1587_v0  ;;  %p303_p6 = scmp.lt.s32.totalorder %s1215_s12, 31  ;;  %1504 = vset.pattern.permute.xlu1 %v1587_v0  ;;  %v1399_v2 = vld [vmem:[%s1799_s2 + $0x78] sm:$0xff]  ;;  %v1390_v4 = vld [vmem:[%s1799_s2 + $0x30] sm:$0xff]  ;;  %p296_p7 = scmp.lt.s32.totalorder %s1212_s22, 7  ;;  %v1389_v7 = vld [vmem:[%s1799_s2 + $0x28] sm:$0xff] }
  0x13   : > { %1505 = vset.pattern.permute.xlu2 %v1587_v0  ;;  %530 = vmatpush.bf16.msra.mxu0 %v1391_v1  ;;  %v1398_v5 = vld [vmem:[%s1799_s2 + $0x70] sm:$0xff]  ;;  %v1397_v8 = vld [vmem:[%s1799_s2 + $0x68] sm:$0xff]  ;;  %v1388_v10 = vld [vmem:[%s1799_s2 + $0x20] sm:$0xff] }
  0x14   : > { %s1806_s12 = smov (!%p303_p6, %s1215_s12), 31  ;;  %579 = vmatpush.bf16.msra.mxu1 %v1399_v2  ;;  %s1808_s22 = smov (!%p296_p7, %s1212_s22), 7  ;;  %v1396_v11 = vld [vmem:[%s1799_s2 + $0x60] sm:$0xff]  ;;  %v1387_v13 = vld [vmem:[%s1799_s2 + $0x18] sm:$0xff]  ;;  %v1386_v16 = vld [vmem:[%s1799_s2 + $0x10] sm:$0xff] }
  0x15   : > { %s1216_s13 = sshll.u32 %s1806_s12, 3  ;;  %v1395_v14 = vld [vmem:[%s1799_s2 + $0x58] sm:$0xff]  ;;  %v1394_v17 = vld [vmem:[%s1799_s2 + $0x50] sm:$0xff]  ;;  %v1385_v25 = vld [vmem:[%s1799_s2 + $0x8] sm:$0xff]  ;;  %s1218_s20 = sshll.u32 %s1806_s12, 2 }
  0x16   : > { %s1665_s16 = scalar_lea.vmem %s1798_s1, %s1216_s13  ;;  %s1383_s13 = sshll.u32 %s1808_s22, 4  ;;  %v1393_v26 = vld [vmem:[%s1799_s2 + $0x48] sm:$0xff]  ;;  %v1384_v32 = vld [vmem:[%s1799_s2] sm:$0xff] }
  0x17   : > { %v628_v3 = vld [vmem:[%s1665_s16] sm:$0xff]  ;;  %v630_v6 = vld [vmem:[%s1665_s16 + $0x10] sm:$0xff]  ;;  %531 = vmatpush.bf16.msra.mxu0 %v1390_v4  ;;  %v629_v9 = vld [vmem:[%s1665_s16 + $0x8] sm:$0xff]  ;;  %s1706_s23 = scalar_lea.vmem %s1797_s0, %s1383_s13  ;;  %s1770_s24 = scalar_lea.vmem %s1803_s6, %s1218_s20 }
  0x18   : > { %646 = vperm.xlu0 %1503, %v628_v3   ;;  %580 = vmatpush.bf16.msra.mxu1 %v1398_v5  ;;  %v631_v12 = vld [vmem:[%s1665_s16 + $0x18] sm:$0xff]  ;;  %v634_v15 = vld [vmem:[%s1665_s16 + $0x30] sm:$0xff]  ;;  %v314_v18 = vld [vmem:[%s1706_s23] sm:$0xff] }
  0x19   : > { %656 = vperm.xlu1 %1504, %v630_v6   ;;  %v315_v19 = vld [vmem:[%s1706_s23 + $0x8] sm:$0xff]  ;;  %v635_v20 = vld [vmem:[%s1665_s16 + $0x38] sm:$0xff]  ;;  %v322_v21 = vunpack.c.0.s8 %v314_v18  ;;  %v324_v22 = vunpack.c.1.s8 %v314_v18  ;;  %v1392_v33 = vld [vmem:[%s1799_s2 + $0x40] sm:$0xff]  ;;  %v326_v40 = vunpack.c.2.s8 %v314_v18  ;;  %v328_v41 = vunpack.c.3.s8 %v314_v18 }
  0x1a   : > { %v323_v23 = vunpack.c.0.s8 %v315_v19  ;;  %v325_v24 = vunpack.c.1.s8 %v315_v19  ;;  %v637_v27 = vld [vmem:[%s1665_s16 + $0x48] sm:$0xff]  ;;  %v638_v34 = vld [vmem:[%s1665_s16 + $0x50] sm:$0xff]  ;;  %v640_v37 = vld [vmem:[%s1665_s16 + $0x60] sm:$0xff]  ;;  %v327_v42 = vunpack.c.2.s8 %v315_v19  ;;  %v329_v43 = vunpack.c.3.s8 %v315_v19 }
  0x1b   : > { %532 = vmatpush.bf16.msra.mxu0 %v1389_v7  ;;  %v354_v28 = vcvt.s32.f32 %v322_v21  ;;  %v356_v29 = vcvt.s32.f32 %v324_v22  ;;  %v632_v38 = vld [vmem:[%s1665_s16 + $0x20] sm:$0xff]  ;;  %v641_v39 = vld [vmem:[%s1665_s16 + $0x68] sm:$0xff]  ;;  %v643_v44 = vld [vmem:[%s1665_s16 + $0x78] sm:$0xff]  ;;  %v358_v46 = vcvt.s32.f32 %v326_v40  ;;  %v360_v47 = vcvt.s32.f32 %v328_v41 }
  0x1c   : > { %581 = vmatpush.bf16.msra.mxu1 %v1397_v8  ;;  %v355_v30 = vcvt.s32.f32 %v323_v23  ;;  %v357_v31 = vcvt.s32.f32 %v325_v24  ;;  %666 = vperm.xlu2 %1505, %v632_v38   ;;  %v633_v45 = vld [vmem:[%s1665_s16 + $0x28] sm:$0xff]  ;;  %v359_v48 = vcvt.s32.f32 %v327_v42  ;;  %v361_v49 = vcvt.s32.f32 %v329_v43  ;;  %v636_v52 = vld [vmem:[%s1665_s16 + $0x40] sm:$0xff]  ;;  %v316_v53 = vld [vmem:[%s1706_s23 + $0x10] sm:$0xff] }
  0x1d   : > { %v386_v35 = vpack.c.bf16 %v356_v29, %v354_v28  ;;  %v388_v50 = vpack.c.bf16 %v360_v47, %v358_v46  ;;  %v317_v54 = vld [vmem:[%s1706_s23 + $0x18] sm:$0xff]  ;;  %v330_v55 = vunpack.c.0.s8 %v316_v53  ;;  %v332_v56 = vunpack.c.1.s8 %v316_v53  ;;  %v642_v2 = vld [vmem:[%s1665_s16 + $0x70] sm:$0xff]  ;;  %v1412_v40 = vld [vmem:[#allocation2 + $0x20] sm:$0xff] }
  0x1e   : > { %v387_v36 = vpack.c.bf16 %v357_v31, %v355_v30  ;;  %v389_v51 = vpack.c.bf16 %v361_v49, %v359_v48  ;;  %v331_v57 = vunpack.c.0.s8 %v317_v54  ;;  %v333_v58 = vunpack.c.1.s8 %v317_v54  ;;  %v639_v59 = vld [vmem:[%s1665_s16 + $0x58] sm:$0xff]  ;;  %v320_v41 = vld [vmem:[%s1706_s23 + $0x30] sm:$0xff]  ;;  %v1421_v43 = vld [vmem:[#allocation4 + $0x28] sm:$0xff]  ;;  %s1283_s16 = sshll.u32 %s1632_s25, 7 }
  0x1f   : > { %533 = vmatpush.bf16.msra.mxu0 %v1388_v10  ;;  %v362_v60 = vcvt.s32.f32 %v330_v55  ;;  %v364_v61 = vcvt.s32.f32 %v332_v56  ;;  %v334_v3 = vunpack.c.2.s8 %v316_v53  ;;  %v336_v4 = vunpack.c.3.s8 %v316_v53  ;;  %v321_v42 = vld [vmem:[%s1706_s23 + $0x38] sm:$0xff]  ;;  %v1420_v49 = vld [vmem:[#allocation4 + $0x20] sm:$0xff]  ;;  %s741_s13 = sshra.s32 %s1283_s16, 3  ;;  %v1409_v56 = vld [vmem:[#allocation2 + $0x8] sm:$0xff] }
  0x20   : > { %651 = vperm.xlu0 %1503, %v629_v9   ;;  %582 = vmatpush.bf16.msra.mxu1 %v1396_v11  ;;  %v363_v62 = vcvt.s32.f32 %v331_v57  ;;  %v365_v63 = vcvt.s32.f32 %v333_v58  ;;  %v335_v5 = vunpack.c.2.s8 %v317_v54  ;;  %v337_v6 = vunpack.c.3.s8 %v317_v54  ;;  %s1284_s14 = sshll.u32 %s741_s13, 2  ;;  %v1419_v55 = vld [vmem:[#allocation4 + $0x18] sm:$0xff] }
  0x21   : > { %661 = vperm.xlu1 %1504, %v631_v12   ;;  %v390_v0 = vpack.c.bf16 %v364_v61, %v362_v60  ;;  %v366_v7 = vcvt.s32.f32 %v334_v3  ;;  %v368_v8 = vcvt.s32.f32 %v336_v4  ;;  %v348_v46 = vunpack.c.1.s8 %v320_v41  ;;  %s1749_s17 = scalar_lea.vmem %s1799_s2, %s1284_s14  ;;  %v1408_v60 = vld [vmem:[#allocation2] sm:$0xff] }
  0x22   : > { %v391_v1 = vpack.c.bf16 %v365_v63, %v363_v62  ;;  %v367_v9 = vcvt.s32.f32 %v335_v5  ;;  %v369_v10 = vcvt.s32.f32 %v337_v6  ;;  %v347_v47 = vunpack.c.0.s8 %v321_v42  ;;  %v1400_v61 = vld [vmem:[%s1749_s17] sm:$0xff]  ;;  %v1417_v62 = vld [vmem:[#allocation4 + $0x8] sm:$0xff] }
  0x23   : > { %534 = vmatpush.bf16.msra.mxu0 %v1387_v13  ;;  %v392_v11 = vpack.c.bf16 %v368_v8, %v366_v7  ;;  %v318_v13 = vld [vmem:[%s1706_s23 + $0x20] sm:$0xff]  ;;  %v349_v48 = vunpack.c.1.s8 %v321_v42  ;;  %v350_v63 = vunpack.c.2.s8 %v320_v41 }
  0x24   : > { %583 = vmatpush.bf16.msra.mxu1 %v1395_v14  ;;  %671 = vperm.xlu2 %1505, %v633_v45   ;;  %v393_v12 = vpack.c.bf16 %v369_v10, %v367_v9  ;;  %v319_v14 = vld [vmem:[%s1706_s23 + $0x28] sm:$0xff]  ;;  %v342_v28 = vunpack.c.2.s8 %v318_v13  ;;  %v344_v29 = vunpack.c.3.s8 %v318_v13  ;;  %v346_v45 = vunpack.c.0.s8 %v320_v41  ;;  %v1416_v3 = vld [vmem:[#allocation4] sm:$0xff] }
  0x25   : > { %v341_v18 = vunpack.c.1.s8 %v319_v14  ;;  %v343_v30 = vunpack.c.2.s8 %v319_v14  ;;  %v345_v31 = vunpack.c.3.s8 %v319_v14  ;;  %v379_v53 = vcvt.s32.f32 %v347_v47  ;;  %v1401_v10 = vld [vmem:[%s1749_s17 + $0x8] sm:$0xff] }
  0x26   : > { %v381_v54 = vcvt.s32.f32 %v349_v48  ;;  %v382_v4 = vcvt.s32.f32 %v350_v63 }
  0x27   : > { %535 = vmatpush.bf16.msra.mxu0 %v1386_v16  ;;  %v340_v16 = vunpack.c.1.s8 %v318_v13  ;;  %v373_v22 = vcvt.s32.f32 %v341_v18 }
  0x28   : > { %676 = vperm.xlu0 %1503, %v634_v15   ;;  %584 = vmatpush.bf16.msra.mxu1 %v1394_v17  ;;  %v338_v15 = vunpack.c.0.s8 %v318_v13  ;;  %v339_v17 = vunpack.c.0.s8 %v319_v14  ;;  %v399_v58 = vpack.c.bf16 %v381_v54, %v379_v53  ;;  %v1402_v14 = vld [vmem:[%s1749_s17 + $0x10] sm:$0xff] }
  0x29   : > { %681 = vperm.xlu1 %1504, %v635_v20   ;;  %v372_v20 = vcvt.s32.f32 %v340_v16 }
  0x2a   : > { %v370_v19 = vcvt.s32.f32 %v338_v15  ;;  %v371_v21 = vcvt.s32.f32 %v339_v17 }
  0x2b   : > { %536 = vmatpush.bf16.msra.mxu0 %v1385_v25  ;;  %v1415_v25 = vld [vmem:[#allocation2 + $0x38] sm:$0xff] }
  0x2c   : > { %585 = vmatpush.bf16.msra.mxu1 %v1393_v26  ;;  %686 = vperm.xlu2 %1505, %v636_v52   ;;  %v394_v23 = vpack.c.bf16 %v372_v20, %v370_v19  ;;  %v395_v24 = vpack.c.bf16 %v373_v22, %v371_v21  ;;  %v1414_v26 = vld [vmem:[#allocation2 + $0x30] sm:$0xff]  ;;  %v380_v52 = vcvt.s32.f32 %v348_v46 }
  0x2d   : > { %994 = vmatpush.bf16.msra.mxu3 %v1415_v25 }
  0x2f   : > { %537 = vmatpush.bf16.msra.mxu0 %v1384_v32  ;;  %v1413_v32 = vld [vmem:[#allocation2 + $0x28] sm:$0xff] }
  0x30   : > { %691 = vperm.xlu0 %1503, %v637_v27   ;;  %586 = vmatpush.bf16.msra.mxu1 %v1392_v33  ;;  %v1423_v27 = vld [vmem:[#allocation4 + $0x38] sm:$0xff]  ;;  %v374_v33 = vcvt.s32.f32 %v342_v28 }
  0x31   : > { %696 = vperm.xlu1 %1504, %v638_v34   ;;  %849 = vmatpush.bf16.msra.mxu2 %v1423_v27  ;;  %v376_v34 = vcvt.s32.f32 %v344_v29 }
  0x32   : > { %538 = vmatmul.bf16.vlgmr.msra.gmra.mxu0 %v386_v35  ;;  %995 = vmatpush.bf16.msra.mxu3 %v1414_v26  ;;  %v375_v35 = vcvt.s32.f32 %v343_v30  ;;  %v1403_v26 = vld [vmem:[%s1749_s17 + $0x18] sm:$0xff] }
  0x33   : > { %587 = vmatmul.bf16.vlgmr.msra.gmra.mxu1 %v387_v36  ;;  %v377_v36 = vcvt.s32.f32 %v345_v31 }
  0x34   : > { %701 = vperm.xlu2 %1505, %v639_v59   ;;  %v1418_v59 = vld [vmem:[#allocation4 + $0x10] sm:$0xff] }
  0x35   : > { %v397_v38 = vpack.c.bf16 %v377_v36, %v375_v35 }
  0x36   : > { %996 = vmatpush.bf16.msra.mxu3 %v1413_v32 }
  0x38   : > { %706 = vperm.xlu0 %1503, %v640_v37   ;;  %v396_v37 = vpack.c.bf16 %v376_v34, %v374_v33 }
  0x39   : > { %711 = vperm.xlu1 %1504, %v641_v39   ;;  %v1422_v39 = vld [vmem:[#allocation4 + $0x30] sm:$0xff] }
  0x3a   : > { %850 = vmatpush.bf16.msra.mxu2 %v1422_v39  ;;  %997 = vmatpush.bf16.msra.mxu3 %v1412_v40 }
  0x3c   : > { %716 = vperm.xlu2 %1505, %v642_v2   ;;  %v353_v2 = vunpack.c.3.s8 %v321_v42 }
  0x3e   : > { %851 = vmatpush.bf16.msra.mxu2 %v1421_v43  ;;  %v385_v7 = vcvt.s32.f32 %v353_v2 }
  0x40   : > { %721 = vperm.xlu0 %1503, %v643_v44   ;;  %v1411_v44 = vld [vmem:[#allocation2 + $0x18] sm:$0xff] }
  0x41   : > { %998 = vmatpush.bf16.msra.mxu3 %v1411_v44 }
  0x42   : > { %543 = vmatmul.bf16.gmra.mxu0 %v388_v50  ;;  %v1410_v50 = vld [vmem:[#allocation2 + $0x10] sm:$0xff]  ;;  %852 = vmatpush.bf16.msra.mxu2 %v1420_v49  ;;  %v1405_v49 = vld [vmem:[%s1749_s17 + $0x28] sm:$0xff] }
  0x43   : > { %592 = vmatmul.bf16.gmra.mxu1 %v389_v51  ;;  %v378_v51 = vcvt.s32.f32 %v346_v45 }
  0x45   : > { %999 = vmatpush.bf16.msra.mxu3 %v1410_v50  ;;  %v398_v57 = vpack.c.bf16 %v380_v52, %v378_v51 }
  0x46   : > { %853 = vmatpush.bf16.msra.mxu2 %v1419_v55 }
  0x49   : > { %1000 = vmatpush.bf16.msra.mxu3 %v1409_v56 }
  0x4a   : > { %854 = vmatpush.bf16.msra.mxu2 %v1418_v59 }
  0x4d   : > { %1001 = vmatpush.bf16.msra.mxu3 %v1408_v60 }
  0x4e   : > { %855 = vmatpush.bf16.msra.mxu2 %v1417_v62 }
  0x50   : > { %1002 = vmatmul.bf16.vlgmr.msra.gmra.mxu3 %v1400_v61  ;;  %v1406_v61 = vld [vmem:[%s1749_s17 + $0x30] sm:$0xff] }
  0x52   : > { %548 = vmatmul.bf16.gmra.mxu0 %v390_v0  ;;  %v352_v0 = vunpack.c.3.s8 %v320_v41  ;;  %856 = vmatpush.bf16.msra.mxu2 %v1416_v3 }
  0x53   : > { %597 = vmatmul.bf16.gmra.mxu1 %v391_v1  ;;  %v351_v1 = vunpack.c.2.s8 %v321_v42 }
  0x54   : > { %v384_v5 = vcvt.s32.f32 %v352_v0 }
  0x55   : > { %v383_v6 = vcvt.s32.f32 %v351_v1 }
  0x56   : > { %v400_v8 = vpack.c.bf16 %v384_v5, %v382_v4 }
  0x57   : > { %v401_v9 = vpack.c.bf16 %v385_v7, %v383_v6 }
  0x60   : > { %1007 = vmatmul.bf16.gmra.mxu3 %v1401_v10 }
  0x62   : > { %553 = vmatmul.bf16.gmra.mxu0 %v392_v11 }
  0x63   : > { %602 = vmatmul.bf16.gmra.mxu1 %v393_v12 }
  0x70   : > { %1012 = vmatmul.bf16.gmra.mxu3 %v1402_v14 }
  0x72   : > { %558 = vmatmul.bf16.gmra.mxu0 %v394_v23 }
  0x73   : > { %607 = vmatmul.bf16.gmra.mxu1 %v395_v24 }
  0x76   : > { %v667_v35 = vpop.permute.xlu2 %666 }
  0x7e   : > { %v672_v43 = vpop.permute.xlu2 %671 }
  0x80   : > { %1017 = vmatmul.bf16.gmra.mxu3 %v1403_v26 }
  0x82   : > { %563 = vmatmul.bf16.gmra.mxu0 %v396_v37 }
  0x83   : > { %612 = vmatmul.bf16.gmra.mxu1 %v397_v38  ;;  %v1404_v38 = vld [vmem:[%s1749_s17 + $0x20] sm:$0xff] }
  0x86   : > { %v687_v3 = vpop.permute.xlu2 %686 }
  0x8a   : > { %v647_v11 = vpop.permute.xlu0 %646 }
  0x8b   : > { %v657_v23 = vpop.permute.xlu1 %656 }
  0x90   : > { %1022 = vmatmul.bf16.gmra.mxu3 %v1404_v38 }
  0x92   : > { %568 = vmatmul.bf16.gmra.mxu0 %v398_v57  ;;  %v652_v19 = vpop.permute.xlu0 %651 }
  0x93   : > { %617 = vmatmul.bf16.gmra.mxu1 %v399_v58  ;;  %v662_v31 = vpop.permute.xlu1 %661 }
  0x9a   : > { %v677_v54 = vpop.permute.xlu0 %676 }
  0x9b   : > { %v682_v55 = vpop.permute.xlu1 %681 }
  0xa0   : > { %1027 = vmatmul.bf16.gmra.mxu3 %v1405_v49 }
  0xa2   : > { %573 = vmatmul.bf16.gmra.mxu0 %v400_v8  ;;  %v692_v2 = vpop.permute.xlu0 %691 }
  0xa3   : > { %622 = vmatmul.bf16.gmra.mxu1 %v401_v9  ;;  %v1407_v9 = vld [vmem:[%s1749_s17 + $0x38] sm:$0xff]  ;;  %v697_v14 = vpop.permute.xlu1 %696 }
  0xab   : > { %v712_v26 = vpop.permute.xlu1 %711 }
  0xaf   : > { %v539_v12 = vpop.f32.mrf.mxu0 }
  0xb0   : > { %v588_v13 = vpop.f32.mrf.mxu1  ;;  %1032 = vmatmul.bf16.gmra.mxu3 %v1406_v61 }
  0xb1   : > { %v589_v15 = vadd.f32 %v588_v13, %v539_v12 }
  0xb3   : > { %v724_v20 = vmul.f32 %v647_v11, %v589_v15  ;;  %v702_v15 = vpop.permute.xlu2 %701 }
  0xb7   : > { %v541_v16 = vpop.f32.mrf.mxu0 }
  0xb8   : > { %v590_v17 = vpop.f32.mrf.mxu1 }
  0xb9   : > { %v591_v18 = vadd.f32 %v590_v17, %v541_v16 }
  0xbb   : > { %v725_v21 = vmul.f32 %v652_v19, %v591_v18  ;;  %v717_v38 = vpop.permute.xlu2 %716 }
  0xbd   : > { %v777_v22 = vpack.c.bf16 %v725_v21, %v724_v20 }
  0xbf   : > { %857 = vmatmul.bf16.vlgmr.msra.gmra.mxu2 %v777_v22  ;;  %v544_v24 = vpop.f32.mrf.mxu0 }
  0xc0   : > { %v593_v25 = vpop.f32.mrf.mxu1  ;;  %1037 = vmatmul.bf16.gmra.mxu3 %v1407_v9 }
  0xc1   : > { %v594_v27 = vadd.f32 %v593_v25, %v544_v24  ;;  %v707_v25 = vpop.permute.xlu0 %706 }
  0xc3   : > { %v726_v32 = vmul.f32 %v657_v23, %v594_v27 }
  0xc7   : > { %v546_v28 = vpop.f32.mrf.mxu0 }
  0xc8   : > { %v595_v29 = vpop.f32.mrf.mxu1 }
  0xc9   : > { %v596_v30 = vadd.f32 %v595_v29, %v546_v28 }
  0xcb   : > { %v727_v33 = vmul.f32 %v662_v31, %v596_v30 }
  0xcd   : > { %v778_v34 = vpack.c.bf16 %v727_v33, %v726_v32 }
  0xcf   : > { %862 = vmatmul.bf16.gmra.mxu2 %v778_v34  ;;  %v549_v36 = vpop.f32.mrf.mxu0 }
  0xd0   : > { %v598_v37 = vpop.f32.mrf.mxu1 }
  0xd1   : > { %v599_v39 = vadd.f32 %v598_v37, %v549_v36  ;;  %v722_v37 = vpop.permute.xlu0 %721 }
  0xd3   : > { %v728_v44 = vmul.f32 %v667_v35, %v599_v39  ;;  %v1003_v32 = vpop.f32.mrf.mxu3 }
  0xd7   : > { %v551_v40 = vpop.f32.mrf.mxu0 }
  0xd8   : > { %v600_v41 = vpop.f32.mrf.mxu1 }
  0xd9   : > { %v601_v42 = vadd.f32 %v600_v41, %v551_v40 }
  0xdb   : > { %v729_v45 = vmul.f32 %v672_v43, %v601_v42  ;;  %v1005_v42 = vpop.f32.mrf.mxu3 }
  0xdd   : > { %v779_v46 = vpack.c.bf16 %v729_v45, %v728_v44 }
  0xdf   : > { %867 = vmatmul.bf16.gmra.mxu2 %v779_v46  ;;  %v554_v47 = vpop.f32.mrf.mxu0 }
  0xe0   : > { %v603_v48 = vpop.f32.mrf.mxu1 }
  0xe1   : > { %v604_v50 = vadd.f32 %v603_v48, %v554_v47  ;;  %v1762_v47 = vld [vmem:[%s1802_s5] ss:$0 sm:$0xff] }
  0xe3   : > { %v730_v56 = vmul.f32 %v677_v54, %v604_v50  ;;  %v1008_v43 = vpop.f32.mrf.mxu3 }
  0xe7   : > { %v556_v51 = vpop.f32.mrf.mxu0 }
  0xe8   : > { %v605_v52 = vpop.f32.mrf.mxu1 }
  0xe9   : > { %v606_v53 = vadd.f32 %v605_v52, %v556_v51 }
  0xeb   : > { %v731_v57 = vmul.f32 %v682_v55, %v606_v53  ;;  %v1010_v45 = vpop.f32.mrf.mxu3 }
  0xed   : > { %v780_v58 = vpack.c.bf16 %v731_v57, %v730_v56 }
  0xef   : > { %872 = vmatmul.bf16.gmra.mxu2 %v780_v58  ;;  %v559_v59 = vpop.f32.mrf.mxu0 }
  0xf0   : > { %v608_v60 = vpop.f32.mrf.mxu1 }
  0xf1   : > { %v609_v62 = vadd.f32 %v608_v60, %v559_v59 }
  0xf3   : > { %v732_v4 = vmul.f32 %v687_v3, %v609_v62  ;;  %v1013_v51 = vpop.f32.mrf.mxu3 }
  0xf7   : > { %v561_v63 = vpop.f32.mrf.mxu0 }
  0xf8   : > { %v610_v0 = vpop.f32.mrf.mxu1 }
  0xf9   : > { %v611_v1 = vadd.f32 %v610_v0, %v561_v63 }
  0xfb   : > { %v733_v5 = vmul.f32 %v692_v2, %v611_v1  ;;  %v1015_v57 = vpop.f32.mrf.mxu3 }
  0xfd   : > { %v781_v6 = vpack.c.bf16 %v733_v5, %v732_v4 }
  0xff   : > { %877 = vmatmul.bf16.gmra.mxu2 %v781_v6  ;;  %v564_v7 = vpop.f32.mrf.mxu0 }
 0x100   : > { %v613_v8 = vpop.f32.mrf.mxu1 }
 0x101   : > { %v614_v10 = vadd.f32 %v613_v8, %v564_v7 }
 0x103   : > { %v734_v16 = vmul.f32 %v697_v14, %v614_v10  ;;  %v1018_v1 = vpop.f32.mrf.mxu3 }
 0x107   : > { %v566_v11 = vpop.f32.mrf.mxu0 }
 0x108   : > { %v615_v12 = vpop.f32.mrf.mxu1 }
 0x109   : > { %v616_v13 = vadd.f32 %v615_v12, %v566_v11 }
 0x10b   : > { %v735_v17 = vmul.f32 %v702_v15, %v616_v13  ;;  %v1020_v6 = vpop.f32.mrf.mxu3 }
 0x10d   : > { %v782_v18 = vpack.c.bf16 %v735_v17, %v734_v16 }
 0x10f   : > { %882 = vmatmul.bf16.gmra.mxu2 %v782_v18  ;;  %v569_v19 = vpop.f32.mrf.mxu0 }
 0x110   : > { %v618_v20 = vpop.f32.mrf.mxu1 }
 0x111   : > { %v619_v21 = vadd.f32 %v618_v20, %v569_v19 }
 0x113   : > { %v736_v27 = vmul.f32 %v707_v25, %v619_v21  ;;  %v1023_v14 = vpop.f32.mrf.mxu3 }
 0x117   : > { %v571_v22 = vpop.f32.mrf.mxu0 }
 0x118   : > { %v620_v23 = vpop.f32.mrf.mxu1 }
 0x119   : > { %v621_v24 = vadd.f32 %v620_v23, %v571_v22 }
 0x11b   : > { %v737_v28 = vmul.f32 %v712_v26, %v621_v24  ;;  %v1025_v20 = vpop.f32.mrf.mxu3 }
 0x11d   : > { %v783_v29 = vpack.c.bf16 %v737_v28, %v736_v27 }
 0x11f   : > { %887 = vmatmul.bf16.gmra.mxu2 %v783_v29  ;;  %v574_v30 = vpop.f32.mrf.mxu0 }
 0x120   : > { %v623_v31 = vpop.f32.mrf.mxu1 }
 0x121   : > { %v624_v33 = vadd.f32 %v623_v31, %v574_v30 }
 0x123   : > { %v738_v39 = vmul.f32 %v717_v38, %v624_v33  ;;  %v1028_v26 = vpop.f32.mrf.mxu3 }
 0x127   : > { %v576_v34 = vpop.f32.mrf.mxu0 }
 0x128   : > { %v625_v35 = vpop.f32.mrf.mxu1 }
 0x129   : > { %v626_v36 = vadd.f32 %v625_v35, %v576_v34 }
 0x12b   : > { %v739_v40 = vmul.f32 %v722_v37, %v626_v36  ;;  %v1030_v35 = vpop.f32.mrf.mxu3 }
 0x12d   : > { %v784_v41 = vpack.c.bf16 %v739_v40, %v738_v39 }
 0x12f   : > { %892 = vmatmul.bf16.gmra.mxu2 %v784_v41 }
 0x133   : > { %v1033_v40 = vpop.f32.mrf.mxu3 }
 0x142   : > { %v858_v44 = vpop.f32.mrf.mxu2 }
 0x143   : > { %v1004_v46 = vadd.f32 %v1003_v32, %v858_v44 }
 0x145   : > { %v1047_v49 = vadd.f32 %v1762_v47, %v1004_v46  ;;  %v1035_v46 = vpop.f32.mrf.mxu3 }
 0x147   : > { %v1063_v53 = vmax.f32 %v1047_v49, 0.0 }
 0x14a   : > { %v860_v48 = vpop.f32.mrf.mxu2 }
 0x14b   : > { %v1006_v50 = vadd.f32 %v1005_v42, %v860_v48 }
 0x14d   : > { %v1048_v52 = vadd.f32 %v1762_v47, %v1006_v50 }
 0x14f   : > { %v1064_v54 = vmax.f32 %v1048_v52, 0.0 }
 0x151   : > { %v1427_v55 = vpack.c.bf16 %v1064_v54, %v1063_v53 }
 0x152   : > { %v863_v56 = vpop.f32.mrf.mxu2 }
 0x153   : > { %1428 = vst [vmem:[%s1770_s24] sm:$0xff] %v1427_v55   ;;  %v1009_v58 = vadd.f32 %v1008_v43, %v863_v56  ;;  %v1038_v55 = vpop.f32.mrf.mxu3 }
 0x155   : > { %v1049_v60 = vadd.f32 %v1762_v47, %v1009_v58 }
 0x157   : > { %v1065_v63 = vmax.f32 %v1049_v60, 0.0 }
 0x15a   : > { %v865_v59 = vpop.f32.mrf.mxu2 }
 0x15b   : > { %v1011_v61 = vadd.f32 %v1010_v45, %v865_v59  ;;  %v1040_v59 = vpop.f32.mrf.mxu3 }
 0x15d   : > { %v1050_v62 = vadd.f32 %v1762_v47, %v1011_v61 }
 0x15f   : > { %v1066_v0 = vmax.f32 %v1050_v62, 0.0 }
 0x161   : > { %v1432_v2 = vpack.c.bf16 %v1066_v0, %v1065_v63 }
 0x162   : > { %v868_v3 = vpop.f32.mrf.mxu2 }
 0x163   : > { %1464 = vst [vmem:[%s1770_s24 + $0x8] sm:$0xff] %v1432_v2   ;;  %v1014_v4 = vadd.f32 %v1013_v51, %v868_v3 }
 0x165   : > { %v1051_v7 = vadd.f32 %v1762_v47, %v1014_v4 }
 0x167   : > { %v1067_v10 = vmax.f32 %v1051_v7, 0.0 }
 0x16a   : > { %v870_v5 = vpop.f32.mrf.mxu2 }
 0x16b   : > { %v1016_v8 = vadd.f32 %v1015_v57, %v870_v5 }
 0x16d   : > { %v1052_v9 = vadd.f32 %v1762_v47, %v1016_v8 }
 0x16f   : > { %v1068_v11 = vmax.f32 %v1052_v9, 0.0 }
 0x171   : > { %v1437_v12 = vpack.c.bf16 %v1068_v11, %v1067_v10 }
 0x172   : > { %v873_v13 = vpop.f32.mrf.mxu2 }
 0x173   : > { %1465 = vst [vmem:[%s1770_s24 + $0x10] sm:$0xff] %v1437_v12   ;;  %v1019_v15 = vadd.f32 %v1018_v1, %v873_v13 }
 0x175   : > { %v1053_v17 = vadd.f32 %v1762_v47, %v1019_v15 }
 0x177   : > { %v1069_v21 = vmax.f32 %v1053_v17, 0.0 }
 0x17a   : > { %v875_v16 = vpop.f32.mrf.mxu2 }
 0x17b   : > { %v1021_v18 = vadd.f32 %v1020_v6, %v875_v16 }
 0x17d   : > { %v1054_v19 = vadd.f32 %v1762_v47, %v1021_v18 }
 0x17f   : > { %v1070_v22 = vmax.f32 %v1054_v19, 0.0 }
 0x181   : > { %v1442_v23 = vpack.c.bf16 %v1070_v22, %v1069_v21 }
 0x182   : > { %v878_v24 = vpop.f32.mrf.mxu2 }
 0x183   : > { %1466 = vst [vmem:[%s1770_s24 + $0x18] sm:$0xff] %v1442_v23   ;;  %v1024_v25 = vadd.f32 %v1023_v14, %v878_v24 }
 0x185   : > { %v1055_v28 = vadd.f32 %v1762_v47, %v1024_v25 }
 0x187   : > { %v1071_v31 = vmax.f32 %v1055_v28, 0.0 }
 0x18a   : > { %v880_v27 = vpop.f32.mrf.mxu2 }
 0x18b   : > { %v1026_v29 = vadd.f32 %v1025_v20, %v880_v27 }
 0x18d   : > { %v1056_v30 = vadd.f32 %v1762_v47, %v1026_v29 }
 0x18f   : > { %v1072_v32 = vmax.f32 %v1056_v30, 0.0 }
 0x191   : > { %v1447_v33 = vpack.c.bf16 %v1072_v32, %v1071_v31 }
 0x192   : > { %v883_v34 = vpop.f32.mrf.mxu2 }
 0x193   : > { %1467 = vst [vmem:[%s1770_s24 + $0x20] sm:$0xff] %v1447_v33   ;;  %v1029_v36 = vadd.f32 %v1028_v26, %v883_v34 }
 0x195   : > { %v1057_v38 = vadd.f32 %v1762_v47, %v1029_v36 }
 0x197   : > { %v1073_v42 = vmax.f32 %v1057_v38, 0.0 }
 0x19a   : > { %v885_v37 = vpop.f32.mrf.mxu2 }
 0x19b   : > { %v1031_v39 = vadd.f32 %v1030_v35, %v885_v37 }
 0x19d   : > { %v1058_v41 = vadd.f32 %v1762_v47, %v1031_v39 }
 0x19f   : > { %v1074_v43 = vmax.f32 %v1058_v41, 0.0 }
 0x1a1   : > { %v1452_v44 = vpack.c.bf16 %v1074_v43, %v1073_v42 }
 0x1a2   : > { %v888_v45 = vpop.f32.mrf.mxu2 }
 0x1a3   : > { %1468 = vst [vmem:[%s1770_s24 + $0x28] sm:$0xff] %v1452_v44   ;;  %v1034_v48 = vadd.f32 %v1033_v40, %v888_v45 }
 0x1a5   : > { %v1059_v50 = vadd.f32 %v1762_v47, %v1034_v48 }
 0x1a7   : > { %v1075_v53 = vmax.f32 %v1059_v50, 0.0 }
 0x1aa   : > { %v890_v49 = vpop.f32.mrf.mxu2 }
 0x1ab   : > { %v1036_v51 = vadd.f32 %v1035_v46, %v890_v49 }
 0x1ad   : > { %v1060_v52 = vadd.f32 %v1762_v47, %v1036_v51 }
 0x1af   : > { %v1076_v54 = vmax.f32 %v1060_v52, 0.0 }
 0x1b1   : > { %v1457_v56 = vpack.c.bf16 %v1076_v54, %v1075_v53 }
 0x1b2   : > { %v893_v57 = vpop.f32.mrf.mxu2 }
 0x1b3   : > { %1469 = vst [vmem:[%s1770_s24 + $0x30] sm:$0xff] %v1457_v56   ;;  %v1039_v58 = vadd.f32 %v1038_v55, %v893_v57 }
 0x1b5   : > { %v1061_v61 = vadd.f32 %v1762_v47, %v1039_v58 }
 0x1b7   : > { %v1077_v0 = vmax.f32 %v1061_v61, 0.0 }
 0x1ba   : > { %v895_v60 = vpop.f32.mrf.mxu2 }
 0x1bb   : > { %v1041_v62 = vadd.f32 %v1040_v59, %v895_v60 }
 0x1bd   : > { %v1062_v63 = vadd.f32 %v1762_v47, %v1041_v62 }
 0x1bf   : > { %v1078_v1 = vmax.f32 %v1062_v63, 0.0 }
 0x1c1   : > { %v1462_v2 = vpack.c.bf16 %v1078_v1, %v1077_v0 }
 0x1c3   : > { %1470 = vst [vmem:[%s1770_s24 + $0x38] sm:$0xff] %v1462_v2  }
 0x1c4 PF: > { %s18_s21 = sadd.s32 1, %s1581_s21  }
 0x1c5   : > { %p15_p8 = scmp.ge.s32.totalorder %s18_s21, 4  }
 0x1c7   :  { %17 = sbr.rel (!%p15_p8) target bundleno = 2 (0x2), region = 87 }
 0x1cc   :  { %1133 = vsyncpa [#allocation3], 1 }
 0x1cd   :  { %1135 = vsyncpa [#allocation3 + $0x1], 1 }
 0x1ce   :  { %1136 = vsyncpa [#allocation5], 1 }

// kernel: sage_forward.5
= control target key start
LH: loop header
LB: loop body
LE: loop exit
PB: predicated region body
PF: predicated region fallthrough
CT: control target
= control target key end

     0   :  { %s1389_s21 = smov 0   ;;  %s1597_s0 = inlined_call_operand.vmem [shape: s8[256,256], index: 0, kind: input, shape index: {}]   ;;  %s1598_s1 = inlined_call_operand.vmem [shape: f32[256,1], index: 1, kind: input, shape index: {}]   ;;  %s1599_s2 = inlined_call_operand.vmem [shape: bf16[256,128], index: 2, kind: input, shape index: {}]   ;;  %s1600_s3 = inlined_call_operand.vmem [shape: bf16[128,128], index: 3, kind: input, shape index: {}]   ;;  %s1601_s4 = inlined_call_operand.vmem [shape: bf16[128,128], index: 4, kind: input, shape index: {}]   ;;  %s1602_s5 = inlined_call_operand.vmem [shape: f32[1,128], index: 5, kind: input, shape index: {}]   ;;  %s1603_s6 = inlined_call_operand.vmem [shape: f32[256,128], index: 6, kind: output, shape index: {}]  }
   0x1 LB: > { %s1395_s22 = sadd.s32 4294967295, %s1351_s21   ;;  %p1119_p0 = scmp.ge.s32.totalorder %s1351_s21, 1  ;;  %s1351_s21 = sphi %s1389_s21, %s16_s21  }
   0x2   : > { %p225_p1 = scmp.lt.s32.totalorder %s1351_s21, 3 }
   0x4   : > { %p226_p2 = pnand %p1119_p0, %p225_p1 }
   0x5   : > { %s1123_s27 = sshll.u32 (!%p226_p2), %s1395_s22, 4  ;;  %s1120_s28 = sshll.u32 (!%p226_p2), %s1395_s22, 2 }
   0x6   : > { %229 = sbr.rel (%p226_p2) target bundleno = 441 (0x1b9), region = 44  ;;  %p269_p3 = scmp.lt.s32.totalorder (!%p226_p2), %s1123_s27, 31 }
   0x7   : > { %p262_p4 = scmp.lt.s32.totalorder (!%p226_p2), %s1120_s28, 7  ;;  %s1191_s19 = sshll.u32 (!%p226_p2), %s1395_s22, 7 }
   0x8   : > { %s707_s24 = sshra.s32 (!%p226_p2), %s1191_s19, 3 }
   0x9   : > { %s1192_s30 = sshll.u32 (!%p226_p2), %s707_s24, 2 }
   0xa   : > { %s1528_s10 = scalar_lea.vmem (!%p226_p2), %s1599_s2, %s1192_s30 }
   0xb   : > { %v1299_v0 = vld [vmem:[%s1599_s2 + $0x38] sm:$0xff]  ;;  %v1353_v2 = vmov 0   ;;  %v1298_v3 = vld [vmem:[%s1599_s2 + $0x30] sm:$0xff]  ;;  %s1605_s27 = smov (!%p269_p3, %s1123_s27), 31  ;;  %v1297_v5 = vld [vmem:[%s1599_s2 + $0x28] sm:$0xff]  ;;  %s1607_s28 = smov (!%p262_p4, %s1120_s28), 7 }
   0xc   : > { %v1307_v1 = vld [vmem:[%s1599_s2 + $0x78] sm:$0xff]  ;;  %1341 = vset.pattern.permute.xlu0 %v1353_v2  ;;  %1342 = vset.pattern.permute.xlu1 %v1353_v2  ;;  %v1306_v4 = vld [vmem:[%s1599_s2 + $0x70] sm:$0xff]  ;;  %s1124_s9 = sshll.u32 %s1605_s27, 3  ;;  %v1305_v6 = vld [vmem:[%s1599_s2 + $0x68] sm:$0xff]  ;;  %s1291_s23 = sshll.u32 %s1607_s28, 4 }
   0xd   : > { %496 = vmatpush.bf16.msra.mxu0 %v1299_v0  ;;  %545 = vmatpush.bf16.msra.mxu1 %v1307_v1  ;;  %s1421_s12 = scalar_lea.vmem %s1598_s1, %s1124_s9  ;;  %v1296_v9 = vld [vmem:[%s1599_s2 + $0x20] sm:$0xff]  ;;  %v1295_v12 = vld [vmem:[%s1599_s2 + $0x18] sm:$0xff]  ;;  %s1448_s8 = scalar_lea.vmem %s1597_s0, %s1291_s23  ;;  %v1294_v15 = vld [vmem:[%s1599_s2 + $0x10] sm:$0xff] }
   0xe   : > { %1343 = vset.pattern.permute.xlu2 %v1353_v2  ;;  %v594_v7 = vld [vmem:[%s1421_s12] sm:$0xff]  ;;  %v596_v8 = vld [vmem:[%s1421_s12 + $0x10] sm:$0xff]  ;;  %v595_v11 = vld [vmem:[%s1421_s12 + $0x8] sm:$0xff]  ;;  %s1560_s24 = scalar_lea.vmem %s1603_s6, %s1124_s9 }
   0xf   : > { %612 = vperm.xlu0 %1341, %v594_v7   ;;  %622 = vperm.xlu1 %1342, %v596_v8   ;;  %v1304_v10 = vld [vmem:[%s1599_s2 + $0x60] sm:$0xff]  ;;  %v1303_v13 = vld [vmem:[%s1599_s2 + $0x58] sm:$0xff]  ;;  %v1302_v16 = vld [vmem:[%s1599_s2 + $0x50] sm:$0xff] }
  0x10   : > { %v597_v14 = vld [vmem:[%s1421_s12 + $0x18] sm:$0xff]  ;;  %v280_v17 = vld [vmem:[%s1448_s8] sm:$0xff]  ;;  %v281_v18 = vld [vmem:[%s1448_s8 + $0x8] sm:$0xff] }
  0x11   : > { %497 = vmatpush.bf16.msra.mxu0 %v1298_v3  ;;  %546 = vmatpush.bf16.msra.mxu1 %v1306_v4  ;;  %v600_v19 = vld [vmem:[%s1421_s12 + $0x30] sm:$0xff]  ;;  %v288_v20 = vunpack.c.0.s8 %v280_v17  ;;  %v290_v21 = vunpack.c.1.s8 %v280_v17  ;;  %v289_v22 = vunpack.c.0.s8 %v281_v18  ;;  %v291_v23 = vunpack.c.1.s8 %v281_v18  ;;  %v1293_v24 = vld [vmem:[%s1599_s2 + $0x8] sm:$0xff]  ;;  %v601_v26 = vld [vmem:[%s1421_s12 + $0x38] sm:$0xff] }
  0x12   : > { %v1301_v25 = vld [vmem:[%s1599_s2 + $0x48] sm:$0xff]  ;;  %v1292_v31 = vld [vmem:[%s1599_s2] sm:$0xff]  ;;  %v604_v36 = vld [vmem:[%s1421_s12 + $0x50] sm:$0xff]  ;;  %v292_v39 = vunpack.c.2.s8 %v280_v17  ;;  %v294_v40 = vunpack.c.3.s8 %v280_v17  ;;  %v293_v41 = vunpack.c.2.s8 %v281_v18  ;;  %v295_v42 = vunpack.c.3.s8 %v281_v18 }
  0x13   : > { %v320_v27 = vcvt.s32.f32 %v288_v20  ;;  %v322_v28 = vcvt.s32.f32 %v290_v21  ;;  %v321_v29 = vcvt.s32.f32 %v289_v22  ;;  %v323_v30 = vcvt.s32.f32 %v291_v23  ;;  %v1300_v32 = vld [vmem:[%s1599_s2 + $0x40] sm:$0xff]  ;;  %v603_v33 = vld [vmem:[%s1421_s12 + $0x48] sm:$0xff]  ;;  %v609_v49 = vld [vmem:[%s1421_s12 + $0x78] sm:$0xff] }
  0x14   : > { %v598_v37 = vld [vmem:[%s1421_s12 + $0x20] sm:$0xff]  ;;  %v607_v43 = vld [vmem:[%s1421_s12 + $0x68] sm:$0xff]  ;;  %v324_v45 = vcvt.s32.f32 %v292_v39  ;;  %v326_v46 = vcvt.s32.f32 %v294_v40  ;;  %v325_v47 = vcvt.s32.f32 %v293_v41  ;;  %v327_v48 = vcvt.s32.f32 %v295_v42  ;;  %v282_v53 = vld [vmem:[%s1448_s8 + $0x10] sm:$0xff] }
  0x15   : > { %498 = vmatpush.bf16.msra.mxu0 %v1297_v5  ;;  %547 = vmatpush.bf16.msra.mxu1 %v1305_v6  ;;  %v352_v34 = vpack.c.bf16 %v322_v28, %v320_v27  ;;  %v353_v35 = vpack.c.bf16 %v323_v30, %v321_v29  ;;  %v606_v38 = vld [vmem:[%s1421_s12 + $0x60] sm:$0xff]  ;;  %v599_v44 = vld [vmem:[%s1421_s12 + $0x28] sm:$0xff]  ;;  %v283_v54 = vld [vmem:[%s1448_s8 + $0x18] sm:$0xff]  ;;  %v296_v55 = vunpack.c.0.s8 %v282_v53  ;;  %v298_v56 = vunpack.c.1.s8 %v282_v53 }
  0x16   : > { %632 = vperm.xlu2 %1343, %v598_v37   ;;  %v354_v50 = vpack.c.bf16 %v326_v46, %v324_v45  ;;  %v355_v51 = vpack.c.bf16 %v327_v48, %v325_v47  ;;  %v602_v52 = vld [vmem:[%s1421_s12 + $0x40] sm:$0xff]  ;;  %v297_v57 = vunpack.c.0.s8 %v283_v54  ;;  %v299_v58 = vunpack.c.1.s8 %v283_v54  ;;  %v605_v59 = vld [vmem:[%s1421_s12 + $0x58] sm:$0xff]  ;;  %v608_v2 = vld [vmem:[%s1421_s12 + $0x70] sm:$0xff] }
  0x17   : > { %617 = vperm.xlu0 %1341, %v595_v11   ;;  %627 = vperm.xlu1 %1342, %v597_v14   ;;  %v328_v60 = vcvt.s32.f32 %v296_v55  ;;  %v330_v61 = vcvt.s32.f32 %v298_v56  ;;  %v300_v3 = vunpack.c.2.s8 %v282_v53  ;;  %v302_v4 = vunpack.c.3.s8 %v282_v53  ;;  %v285_v14 = vld [vmem:[%s1448_s8 + $0x28] sm:$0xff]  ;;  %v1322_v30 = vld [vmem:[%s1600_s3 + $0x30] sm:$0xff]  ;;  %v1320_v40 = vld [vmem:[%s1600_s3 + $0x20] sm:$0xff] }
  0x18   : > { %v329_v62 = vcvt.s32.f32 %v297_v57  ;;  %v331_v63 = vcvt.s32.f32 %v299_v58  ;;  %v301_v5 = vunpack.c.2.s8 %v283_v54  ;;  %v303_v6 = vunpack.c.3.s8 %v283_v54  ;;  %v1330_v39 = vld [vmem:[%s1601_s4 + $0x30] sm:$0xff]  ;;  %v287_v42 = vld [vmem:[%s1448_s8 + $0x38] sm:$0xff]  ;;  %v1317_v56 = vld [vmem:[%s1600_s3 + $0x8] sm:$0xff] }
  0x19   : > { %499 = vmatpush.bf16.msra.mxu0 %v1296_v9  ;;  %548 = vmatpush.bf16.msra.mxu1 %v1304_v10  ;;  %v356_v0 = vpack.c.bf16 %v330_v61, %v328_v60  ;;  %v332_v7 = vcvt.s32.f32 %v300_v3  ;;  %v334_v8 = vcvt.s32.f32 %v302_v4  ;;  %v305_v17 = vunpack.c.0.s8 %v285_v14  ;;  %v286_v41 = vld [vmem:[%s1448_s8 + $0x30] sm:$0xff]  ;;  %v1327_v55 = vld [vmem:[%s1601_s4 + $0x18] sm:$0xff]  ;;  %v1316_v60 = vld [vmem:[%s1600_s3] sm:$0xff] }
  0x1a   : > { %v357_v1 = vpack.c.bf16 %v331_v63, %v329_v62  ;;  %v333_v9 = vcvt.s32.f32 %v301_v5  ;;  %v335_v10 = vcvt.s32.f32 %v303_v6  ;;  %v307_v18 = vunpack.c.1.s8 %v285_v14  ;;  %v1308_v61 = vld [vmem:[%s1528_s10] sm:$0xff]  ;;  %v1325_v62 = vld [vmem:[%s1601_s4 + $0x8] sm:$0xff] }
  0x1b   : > { %v358_v11 = vpack.c.bf16 %v334_v8, %v332_v7  ;;  %v337_v21 = vcvt.s32.f32 %v305_v17  ;;  %v309_v28 = vunpack.c.2.s8 %v285_v14  ;;  %v311_v29 = vunpack.c.3.s8 %v285_v14  ;;  %v1324_v3 = vld [vmem:[%s1601_s4] sm:$0xff]  ;;  %v1310_v14 = vld [vmem:[%s1528_s10 + $0x10] sm:$0xff] }
  0x1c   : > { %v339_v22 = vcvt.s32.f32 %v307_v18  ;;  %v312_v45 = vunpack.c.0.s8 %v286_v41  ;;  %v314_v46 = vunpack.c.1.s8 %v286_v41  ;;  %v313_v47 = vunpack.c.0.s8 %v287_v42 }
  0x1d   : > { %500 = vmatpush.bf16.msra.mxu0 %v1295_v12  ;;  %549 = vmatpush.bf16.msra.mxu1 %v1303_v13  ;;  %v359_v12 = vpack.c.bf16 %v335_v10, %v333_v9  ;;  %v284_v13 = vld [vmem:[%s1448_s8 + $0x20] sm:$0xff]  ;;  %v315_v48 = vunpack.c.1.s8 %v287_v42  ;;  %v316_v63 = vunpack.c.2.s8 %v286_v41  ;;  %v1309_v10 = vld [vmem:[%s1528_s10 + $0x8] sm:$0xff] }
  0x1e   : > { %637 = vperm.xlu2 %1343, %v599_v44   ;;  %v310_v27 = vunpack.c.3.s8 %v284_v13  ;;  %v1319_v44 = vld [vmem:[%s1600_s3 + $0x18] sm:$0xff]  ;;  %v345_v53 = vcvt.s32.f32 %v313_v47 }
  0x1f   : > { %642 = vperm.xlu0 %1341, %v600_v19   ;;  %647 = vperm.xlu1 %1342, %v601_v26   ;;  %v308_v26 = vunpack.c.2.s8 %v284_v13  ;;  %v347_v54 = vcvt.s32.f32 %v315_v48  ;;  %v348_v4 = vcvt.s32.f32 %v316_v63 }
  0x21   : > { %501 = vmatpush.bf16.msra.mxu0 %v1294_v15  ;;  %550 = vmatpush.bf16.msra.mxu1 %v1302_v16  ;;  %v304_v15 = vunpack.c.0.s8 %v284_v13  ;;  %v306_v16 = vunpack.c.1.s8 %v284_v13  ;;  %v365_v58 = vpack.c.bf16 %v347_v54, %v345_v53 }
  0x23   : > { %v336_v19 = vcvt.s32.f32 %v304_v15  ;;  %v338_v20 = vcvt.s32.f32 %v306_v16 }
  0x25   : > { %502 = vmatpush.bf16.msra.mxu0 %v1293_v24  ;;  %551 = vmatpush.bf16.msra.mxu1 %v1301_v25  ;;  %v360_v23 = vpack.c.bf16 %v338_v20, %v336_v19  ;;  %v361_v24 = vpack.c.bf16 %v339_v22, %v337_v21  ;;  %v1323_v25 = vld [vmem:[%s1600_s3 + $0x38] sm:$0xff] }
  0x26   : > { %652 = vperm.xlu2 %1343, %v602_v52   ;;  %960 = vmatpush.bf16.msra.mxu3 %v1323_v25  ;;  %v346_v52 = vcvt.s32.f32 %v314_v46 }
  0x27   : > { %657 = vperm.xlu0 %1341, %v603_v33   ;;  %662 = vperm.xlu1 %1342, %v604_v36   ;;  %v341_v33 = vcvt.s32.f32 %v309_v28  ;;  %v1321_v36 = vld [vmem:[%s1600_s3 + $0x28] sm:$0xff] }
  0x29   : > { %503 = vmatpush.bf16.msra.mxu0 %v1292_v31  ;;  %552 = vmatpush.bf16.msra.mxu1 %v1300_v32  ;;  %v340_v31 = vcvt.s32.f32 %v308_v26  ;;  %v342_v32 = vcvt.s32.f32 %v310_v27  ;;  %v1311_v26 = vld [vmem:[%s1528_s10 + $0x18] sm:$0xff] }
  0x2a   : > { %961 = vmatpush.bf16.msra.mxu3 %v1322_v30 }
  0x2b   : > { %v362_v37 = vpack.c.bf16 %v342_v32, %v340_v31 }
  0x2c   : > { %504 = vmatmul.bf16.vlgmr.msra.gmra.mxu0 %v352_v34  ;;  %553 = vmatmul.bf16.vlgmr.msra.gmra.mxu1 %v353_v35  ;;  %v343_v34 = vcvt.s32.f32 %v311_v29  ;;  %v1331_v35 = vld [vmem:[%s1601_s4 + $0x38] sm:$0xff] }
  0x2d   : > { %815 = vmatpush.bf16.msra.mxu2 %v1331_v35 }
  0x2e   : > { %667 = vperm.xlu2 %1343, %v605_v59   ;;  %962 = vmatpush.bf16.msra.mxu3 %v1321_v36  ;;  %v1326_v59 = vld [vmem:[%s1601_s4 + $0x10] sm:$0xff] }
  0x2f   : > { %672 = vperm.xlu0 %1341, %v606_v38   ;;  %677 = vperm.xlu1 %1342, %v607_v43   ;;  %v363_v38 = vpack.c.bf16 %v343_v34, %v341_v33  ;;  %v1329_v43 = vld [vmem:[%s1601_s4 + $0x28] sm:$0xff] }
  0x31   : > { %816 = vmatpush.bf16.msra.mxu2 %v1330_v39 }
  0x32   : > { %963 = vmatpush.bf16.msra.mxu3 %v1320_v40 }
  0x35   : > { %817 = vmatpush.bf16.msra.mxu2 %v1329_v43 }
  0x36   : > { %682 = vperm.xlu2 %1343, %v608_v2   ;;  %964 = vmatpush.bf16.msra.mxu3 %v1319_v44  ;;  %v319_v2 = vunpack.c.3.s8 %v287_v42 }
  0x37   : > { %687 = vperm.xlu0 %1341, %v609_v49   ;;  %v1328_v49 = vld [vmem:[%s1601_s4 + $0x20] sm:$0xff] }
  0x38   : > { %v351_v7 = vcvt.s32.f32 %v319_v2 }
  0x39   : > { %818 = vmatpush.bf16.msra.mxu2 %v1328_v49  ;;  %v1313_v49 = vld [vmem:[%s1528_s10 + $0x28] sm:$0xff] }
  0x3c   : > { %509 = vmatmul.bf16.gmra.mxu0 %v354_v50  ;;  %558 = vmatmul.bf16.gmra.mxu1 %v355_v51  ;;  %v1318_v50 = vld [vmem:[%s1600_s3 + $0x10] sm:$0xff]  ;;  %v344_v51 = vcvt.s32.f32 %v312_v45 }
  0x3d   : > { %965 = vmatpush.bf16.msra.mxu3 %v1318_v50  ;;  %819 = vmatpush.bf16.msra.mxu2 %v1327_v55 }
  0x3e   : > { %v364_v57 = vpack.c.bf16 %v346_v52, %v344_v51 }
  0x41   : > { %966 = vmatpush.bf16.msra.mxu3 %v1317_v56  ;;  %820 = vmatpush.bf16.msra.mxu2 %v1326_v59 }
  0x45   : > { %967 = vmatpush.bf16.msra.mxu3 %v1316_v60  ;;  %821 = vmatpush.bf16.msra.mxu2 %v1325_v62 }
  0x48   : > { %968 = vmatmul.bf16.vlgmr.msra.gmra.mxu3 %v1308_v61  ;;  %v1314_v61 = vld [vmem:[%s1528_s10 + $0x30] sm:$0xff] }
  0x49   : > { %822 = vmatpush.bf16.msra.mxu2 %v1324_v3 }
  0x4c   : > { %514 = vmatmul.bf16.gmra.mxu0 %v356_v0  ;;  %563 = vmatmul.bf16.gmra.mxu1 %v357_v1  ;;  %v318_v0 = vunpack.c.3.s8 %v286_v41  ;;  %v317_v1 = vunpack.c.2.s8 %v287_v42 }
  0x4e   : > { %v350_v5 = vcvt.s32.f32 %v318_v0  ;;  %v349_v6 = vcvt.s32.f32 %v317_v1 }
  0x50   : > { %v366_v8 = vpack.c.bf16 %v350_v5, %v348_v4  ;;  %v367_v9 = vpack.c.bf16 %v351_v7, %v349_v6 }
  0x58   : > { %973 = vmatmul.bf16.gmra.mxu3 %v1309_v10 }
  0x5c   : > { %519 = vmatmul.bf16.gmra.mxu0 %v358_v11  ;;  %568 = vmatmul.bf16.gmra.mxu1 %v359_v12 }
  0x68   : > { %978 = vmatmul.bf16.gmra.mxu3 %v1310_v14 }
  0x6c   : > { %524 = vmatmul.bf16.gmra.mxu0 %v360_v23  ;;  %573 = vmatmul.bf16.gmra.mxu1 %v361_v24 }
  0x70   : > { %v633_v35 = vpop.permute.xlu2 %632 }
  0x78   : > { %983 = vmatmul.bf16.gmra.mxu3 %v1311_v26  ;;  %v638_v43 = vpop.permute.xlu2 %637 }
  0x7c   : > { %529 = vmatmul.bf16.gmra.mxu0 %v362_v37  ;;  %578 = vmatmul.bf16.gmra.mxu1 %v363_v38  ;;  %v1312_v38 = vld [vmem:[%s1528_s10 + $0x20] sm:$0xff] }
  0x80   : > { %v653_v3 = vpop.permute.xlu2 %652 }
  0x81   : > { %v613_v11 = vpop.permute.xlu0 %612  ;;  %v623_v23 = vpop.permute.xlu1 %622 }
  0x88   : > { %988 = vmatmul.bf16.gmra.mxu3 %v1312_v38 }
  0x89   : > { %v618_v19 = vpop.permute.xlu0 %617  ;;  %v628_v31 = vpop.permute.xlu1 %627 }
  0x8c   : > { %534 = vmatmul.bf16.gmra.mxu0 %v364_v57  ;;  %583 = vmatmul.bf16.gmra.mxu1 %v365_v58 }
  0x91   : > { %v643_v54 = vpop.permute.xlu0 %642  ;;  %v648_v55 = vpop.permute.xlu1 %647 }
  0x98   : > { %993 = vmatmul.bf16.gmra.mxu3 %v1313_v49 }
  0x99   : > { %v658_v2 = vpop.permute.xlu0 %657  ;;  %v663_v14 = vpop.permute.xlu1 %662 }
  0x9c   : > { %539 = vmatmul.bf16.gmra.mxu0 %v366_v8  ;;  %588 = vmatmul.bf16.gmra.mxu1 %v367_v9  ;;  %v1315_v9 = vld [vmem:[%s1528_s10 + $0x38] sm:$0xff] }
  0xa1   : > { %v678_v26 = vpop.permute.xlu1 %677 }
  0xa8   : > { %998 = vmatmul.bf16.gmra.mxu3 %v1314_v61 }
  0xa9   : > { %v505_v12 = vpop.f32.mrf.mxu0  ;;  %v554_v13 = vpop.f32.mrf.mxu1 }
  0xaa   : > { %v555_v15 = vadd.f32 %v554_v13, %v505_v12 }
  0xac   : > { %v690_v20 = vmul.f32 %v613_v11, %v555_v15  ;;  %v668_v15 = vpop.permute.xlu2 %667 }
  0xb1   : > { %v507_v16 = vpop.f32.mrf.mxu0  ;;  %v556_v17 = vpop.f32.mrf.mxu1 }
  0xb2   : > { %v557_v18 = vadd.f32 %v556_v17, %v507_v16 }
  0xb4   : > { %v691_v21 = vmul.f32 %v618_v19, %v557_v18  ;;  %v683_v38 = vpop.permute.xlu2 %682 }
  0xb6   : > { %v743_v22 = vpack.c.bf16 %v691_v21, %v690_v20 }
  0xb8   : > { %823 = vmatmul.bf16.vlgmr.msra.gmra.mxu2 %v743_v22  ;;  %1003 = vmatmul.bf16.gmra.mxu3 %v1315_v9 }
  0xb9   : > { %v510_v24 = vpop.f32.mrf.mxu0  ;;  %v559_v25 = vpop.f32.mrf.mxu1 }
  0xba   : > { %v560_v27 = vadd.f32 %v559_v25, %v510_v24  ;;  %v673_v25 = vpop.permute.xlu0 %672 }
  0xbc   : > { %v692_v32 = vmul.f32 %v623_v23, %v560_v27 }
  0xc1   : > { %v512_v28 = vpop.f32.mrf.mxu0  ;;  %v561_v29 = vpop.f32.mrf.mxu1 }
  0xc2   : > { %v562_v30 = vadd.f32 %v561_v29, %v512_v28 }
  0xc4   : > { %v693_v33 = vmul.f32 %v628_v31, %v562_v30 }
  0xc6   : > { %v744_v34 = vpack.c.bf16 %v693_v33, %v692_v32 }
  0xc8   : > { %828 = vmatmul.bf16.gmra.mxu2 %v744_v34 }
  0xc9   : > { %v515_v36 = vpop.f32.mrf.mxu0  ;;  %v564_v37 = vpop.f32.mrf.mxu1 }
  0xca   : > { %v565_v39 = vadd.f32 %v564_v37, %v515_v36  ;;  %v688_v37 = vpop.permute.xlu0 %687 }
  0xcb   : > { %v969_v32 = vpop.f32.mrf.mxu3 }
  0xcc   : > { %v694_v44 = vmul.f32 %v633_v35, %v565_v39 }
  0xd1   : > { %v517_v40 = vpop.f32.mrf.mxu0  ;;  %v566_v41 = vpop.f32.mrf.mxu1 }
  0xd2   : > { %v567_v42 = vadd.f32 %v566_v41, %v517_v40 }
  0xd4   : > { %v695_v45 = vmul.f32 %v638_v43, %v567_v42  ;;  %v971_v42 = vpop.f32.mrf.mxu3 }
  0xd6   : > { %v745_v46 = vpack.c.bf16 %v695_v45, %v694_v44  ;;  %v1553_v44 = vld [vmem:[%s1602_s5] ss:$0 sm:$0xff] }
  0xd8   : > { %833 = vmatmul.bf16.gmra.mxu2 %v745_v46 }
  0xd9   : > { %v520_v47 = vpop.f32.mrf.mxu0  ;;  %v569_v48 = vpop.f32.mrf.mxu1 }
  0xda   : > { %v570_v50 = vadd.f32 %v569_v48, %v520_v47 }
  0xdc   : > { %v696_v56 = vmul.f32 %v643_v54, %v570_v50  ;;  %v974_v43 = vpop.f32.mrf.mxu3 }
  0xe1   : > { %v522_v51 = vpop.f32.mrf.mxu0  ;;  %v571_v52 = vpop.f32.mrf.mxu1 }
  0xe2   : > { %v572_v53 = vadd.f32 %v571_v52, %v522_v51 }
  0xe4   : > { %v697_v57 = vmul.f32 %v648_v55, %v572_v53  ;;  %v976_v46 = vpop.f32.mrf.mxu3 }
  0xe6   : > { %v746_v58 = vpack.c.bf16 %v697_v57, %v696_v56 }
  0xe8   : > { %838 = vmatmul.bf16.gmra.mxu2 %v746_v58 }
  0xe9   : > { %v525_v59 = vpop.f32.mrf.mxu0  ;;  %v574_v60 = vpop.f32.mrf.mxu1 }
  0xea   : > { %v575_v62 = vadd.f32 %v574_v60, %v525_v59 }
  0xec   : > { %v698_v4 = vmul.f32 %v653_v3, %v575_v62  ;;  %v979_v51 = vpop.f32.mrf.mxu3 }
  0xf1   : > { %v527_v63 = vpop.f32.mrf.mxu0  ;;  %v576_v0 = vpop.f32.mrf.mxu1 }
  0xf2   : > { %v577_v1 = vadd.f32 %v576_v0, %v527_v63 }
  0xf4   : > { %v699_v5 = vmul.f32 %v658_v2, %v577_v1  ;;  %v981_v56 = vpop.f32.mrf.mxu3 }
  0xf6   : > { %v747_v6 = vpack.c.bf16 %v699_v5, %v698_v4 }
  0xf8   : > { %843 = vmatmul.bf16.gmra.mxu2 %v747_v6 }
  0xf9   : > { %v530_v7 = vpop.f32.mrf.mxu0  ;;  %v579_v8 = vpop.f32.mrf.mxu1 }
  0xfa   : > { %v580_v10 = vadd.f32 %v579_v8, %v530_v7 }
  0xfc   : > { %v700_v16 = vmul.f32 %v663_v14, %v580_v10  ;;  %v984_v60 = vpop.f32.mrf.mxu3 }
 0x101   : > { %v532_v11 = vpop.f32.mrf.mxu0  ;;  %v581_v12 = vpop.f32.mrf.mxu1 }
 0x102   : > { %v582_v13 = vadd.f32 %v581_v12, %v532_v11 }
 0x104   : > { %v701_v17 = vmul.f32 %v668_v15, %v582_v13  ;;  %v986_v1 = vpop.f32.mrf.mxu3 }
 0x106   : > { %v748_v18 = vpack.c.bf16 %v701_v17, %v700_v16 }
 0x108   : > { %848 = vmatmul.bf16.gmra.mxu2 %v748_v18 }
 0x109   : > { %v535_v19 = vpop.f32.mrf.mxu0  ;;  %v584_v20 = vpop.f32.mrf.mxu1 }
 0x10a   : > { %v585_v21 = vadd.f32 %v584_v20, %v535_v19 }
 0x10c   : > { %v702_v27 = vmul.f32 %v673_v25, %v585_v21  ;;  %v989_v6 = vpop.f32.mrf.mxu3 }
 0x111   : > { %v537_v22 = vpop.f32.mrf.mxu0  ;;  %v586_v23 = vpop.f32.mrf.mxu1 }
 0x112   : > { %v587_v24 = vadd.f32 %v586_v23, %v537_v22 }
 0x114   : > { %v703_v28 = vmul.f32 %v678_v26, %v587_v24  ;;  %v991_v11 = vpop.f32.mrf.mxu3 }
 0x116   : > { %v749_v29 = vpack.c.bf16 %v703_v28, %v702_v27 }
 0x118   : > { %853 = vmatmul.bf16.gmra.mxu2 %v749_v29 }
 0x119   : > { %v540_v30 = vpop.f32.mrf.mxu0  ;;  %v589_v31 = vpop.f32.mrf.mxu1 }
 0x11a   : > { %v590_v33 = vadd.f32 %v589_v31, %v540_v30 }
 0x11c   : > { %v704_v39 = vmul.f32 %v683_v38, %v590_v33  ;;  %v994_v15 = vpop.f32.mrf.mxu3 }
 0x121   : > { %v542_v34 = vpop.f32.mrf.mxu0  ;;  %v591_v35 = vpop.f32.mrf.mxu1 }
 0x122   : > { %v592_v36 = vadd.f32 %v591_v35, %v542_v34 }
 0x124   : > { %v705_v40 = vmul.f32 %v688_v37, %v592_v36  ;;  %v996_v20 = vpop.f32.mrf.mxu3 }
 0x126   : > { %v750_v41 = vpack.c.bf16 %v705_v40, %v704_v39 }
 0x128   : > { %858 = vmatmul.bf16.gmra.mxu2 %v750_v41 }
 0x12c   : > { %v999_v25 = vpop.f32.mrf.mxu3 }
 0x134   : > { %v1001_v30 = vpop.f32.mrf.mxu3 }
 0x13b   : > { %v824_v45 = vpop.f32.mrf.mxu2 }
 0x13c   : > { %v970_v47 = vadd.f32 %v969_v32, %v824_v45  ;;  %v1004_v34 = vpop.f32.mrf.mxu3 }
 0x13e   : > { %v1013_v48 = vadd.f32 %v1553_v44, %v970_v47 }
 0x140   : > { %1029 = vst [vmem:[%s1560_s24] sm:$0xff] %v1013_v48 }
 0x143   : > { %v826_v49 = vpop.f32.mrf.mxu2 }
 0x144   : > { %v972_v50 = vadd.f32 %v971_v42, %v826_v49  ;;  %v1006_v38 = vpop.f32.mrf.mxu3 }
 0x146   : > { %v1014_v52 = vadd.f32 %v1553_v44, %v972_v50 }
 0x148   : > { %1030 = vst [vmem:[%s1560_s24 + $0x8] sm:$0xff] %v1014_v52 }
 0x14b   : > { %v829_v53 = vpop.f32.mrf.mxu2 }
 0x14c   : > { %v975_v54 = vadd.f32 %v974_v43, %v829_v53 }
 0x14e   : > { %v1015_v55 = vadd.f32 %v1553_v44, %v975_v54 }
 0x150   : > { %1031 = vst [vmem:[%s1560_s24 + $0x10] sm:$0xff] %v1015_v55 }
 0x153   : > { %v831_v57 = vpop.f32.mrf.mxu2 }
 0x154   : > { %v977_v58 = vadd.f32 %v976_v46, %v831_v57 }
 0x156   : > { %v1016_v59 = vadd.f32 %v1553_v44, %v977_v58 }
 0x158   : > { %1032 = vst [vmem:[%s1560_s24 + $0x18] sm:$0xff] %v1016_v59 }
 0x15b   : > { %v834_v61 = vpop.f32.mrf.mxu2 }
 0x15c   : > { %v980_v62 = vadd.f32 %v979_v51, %v834_v61 }
 0x15e   : > { %v1017_v63 = vadd.f32 %v1553_v44, %v980_v62 }
 0x160   : > { %1033 = vst [vmem:[%s1560_s24 + $0x20] sm:$0xff] %v1017_v63 }
 0x163   : > { %v836_v0 = vpop.f32.mrf.mxu2 }
 0x164   : > { %v982_v2 = vadd.f32 %v981_v56, %v836_v0 }
 0x166   : > { %v1018_v3 = vadd.f32 %v1553_v44, %v982_v2 }
 0x168   : > { %1034 = vst [vmem:[%s1560_s24 + $0x28] sm:$0xff] %v1018_v3 }
 0x16b   : > { %v839_v4 = vpop.f32.mrf.mxu2 }
 0x16c   : > { %v985_v5 = vadd.f32 %v984_v60, %v839_v4 }
 0x16e   : > { %v1019_v7 = vadd.f32 %v1553_v44, %v985_v5 }
 0x170   : > { %1035 = vst [vmem:[%s1560_s24 + $0x30] sm:$0xff] %v1019_v7 }
 0x173   : > { %v841_v8 = vpop.f32.mrf.mxu2 }
 0x174   : > { %v987_v9 = vadd.f32 %v986_v1, %v841_v8 }
 0x176   : > { %v1020_v10 = vadd.f32 %v1553_v44, %v987_v9 }
 0x178   : > { %1036 = vst [vmem:[%s1560_s24 + $0x38] sm:$0xff] %v1020_v10 }
 0x17b   : > { %v844_v12 = vpop.f32.mrf.mxu2 }
 0x17c   : > { %v990_v13 = vadd.f32 %v989_v6, %v844_v12 }
 0x17e   : > { %v1021_v14 = vadd.f32 %v1553_v44, %v990_v13 }
 0x180   : > { %1037 = vst [vmem:[%s1560_s24 + $0x40] sm:$0xff] %v1021_v14 }
 0x183   : > { %v846_v16 = vpop.f32.mrf.mxu2 }
 0x184   : > { %v992_v17 = vadd.f32 %v991_v11, %v846_v16 }
 0x186   : > { %v1022_v18 = vadd.f32 %v1553_v44, %v992_v17 }
 0x188   : > { %1038 = vst [vmem:[%s1560_s24 + $0x48] sm:$0xff] %v1022_v18 }
 0x18b   : > { %v849_v19 = vpop.f32.mrf.mxu2 }
 0x18c   : > { %v995_v21 = vadd.f32 %v994_v15, %v849_v19 }
 0x18e   : > { %v1023_v22 = vadd.f32 %v1553_v44, %v995_v21 }
 0x190   : > { %1039 = vst [vmem:[%s1560_s24 + $0x50] sm:$0xff] %v1023_v22 }
 0x193   : > { %v851_v23 = vpop.f32.mrf.mxu2 }
 0x194   : > { %v997_v24 = vadd.f32 %v996_v20, %v851_v23 }
 0x196   : > { %v1024_v26 = vadd.f32 %v1553_v44, %v997_v24 }
 0x198   : > { %1040 = vst [vmem:[%s1560_s24 + $0x58] sm:$0xff] %v1024_v26 }
 0x19b   : > { %v854_v27 = vpop.f32.mrf.mxu2 }
 0x19c   : > { %v1000_v28 = vadd.f32 %v999_v25, %v854_v27 }
 0x19e   : > { %v1025_v29 = vadd.f32 %v1553_v44, %v1000_v28 }
 0x1a0   : > { %1041 = vst [vmem:[%s1560_s24 + $0x60] sm:$0xff] %v1025_v29 }
 0x1a3   : > { %v856_v31 = vpop.f32.mrf.mxu2 }
 0x1a4   : > { %v1002_v32 = vadd.f32 %v1001_v30, %v856_v31 }
 0x1a6   : > { %v1026_v33 = vadd.f32 %v1553_v44, %v1002_v32 }
 0x1a8   : > { %1042 = vst [vmem:[%s1560_s24 + $0x68] sm:$0xff] %v1026_v33 }
 0x1ab   : > { %v859_v35 = vpop.f32.mrf.mxu2 }
 0x1ac   : > { %v1005_v36 = vadd.f32 %v1004_v34, %v859_v35 }
 0x1ae   : > { %v1027_v37 = vadd.f32 %v1553_v44, %v1005_v36 }
 0x1b0   : > { %1043 = vst [vmem:[%s1560_s24 + $0x70] sm:$0xff] %v1027_v37 }
 0x1b3   : > { %v861_v39 = vpop.f32.mrf.mxu2 }
 0x1b4   : > { %v1007_v40 = vadd.f32 %v1006_v38, %v861_v39 }
 0x1b6   : > { %v1028_v41 = vadd.f32 %v1553_v44, %v1007_v40 }
 0x1b8   : > { %1044 = vst [vmem:[%s1560_s24 + $0x78] sm:$0xff] %v1028_v41 }
 0x1b9 PF: > { %s16_s21 = sadd.s32 1, %s1351_s21  }
 0x1ba   : > { %p13_p5 = scmp.ge.s32.totalorder %s16_s21, 4  }
 0x1bc   :  { %15 = sbr.rel (!%p13_p5) target bundleno = 1 (0x1), region = 78 }

</bundles_post_ra>
